<compile_context>
chip_gen: v6e
topology: v6e:2x2x1
jax: 0.10.0
libtpu: 0.0.40
codegen_flags: <defaults>
</compile_context>

<pallas_src>
import jax
import jax.numpy as jnp
from jax.experimental import pallas as pl
from jax.experimental.pallas import tpu as pltpu

ALPHA = 2.0        # module default
EROSIONS = 10      # module default

_MAX_BLOCK_BATCH = 8            # static-unroll bound (trace/compile time)
_VMEM_LIMIT_BYTES = 48 * 1024 * 1024   # > v5e/v6e scoped default, < v7x physical
_VMEM_BUDGET_BYTES = 24 * 1024 * 1024  # working-set budget used to pick `bt`


def _pick_block_batch(B, H, W, in_itemsize_sum, use_mxu,
                      budget_bytes=_VMEM_BUDGET_BYTES):
    """Largest divisor of B that fits the VMEM budget, preferring >=2 grid steps."""
    # double-buffered input blocks + ~8 f32 temporaries per resident image
    per_image = H * W * (2 * in_itemsize_sum + 8 * 4)
    fixed = (H * H + W * W) * 4 if use_mxu else 4 * H * W * 4  # shift mats / masks
    cap = max(1, (budget_bytes - fixed) // per_image)
    cap = min(cap, _MAX_BLOCK_BATCH)
    divisors = [d for d in range(1, B + 1) if B % d == 0 and d <= cap]
    if not divisors:
        return 1
    multi = [d for d in divisors if B // d >= 2]   # keep grid length >= 2 (v7x)
    return multi[-1] if multi else divisors[-1]


def _make_kernel(bt, H, W, erosions, alpha, use_mxu):
    weights = [float((k + 1) ** alpha) for k in range(erosions)]

    def kernel(pred_ref, target_ref, out_ref):
        # ---- loop-invariant constants, hoisted out of the erosion loop ----
        if use_mxu:
            # Off-diagonal-ones shift matrices: S_H @ x = up+down neighbours,
            # x @ S_W = left+right neighbours; zero boundaries come for free.
            hi = jax.lax.broadcasted_iota(jnp.int32, (H, H), 0)
            hj = jax.lax.broadcasted_iota(jnp.int32, (H, H), 1)
            s_rows = (jnp.abs(hi - hj) == 1).astype(jnp.float32)
            wi = jax.lax.broadcasted_iota(jnp.int32, (W, W), 0)
            wj = jax.lax.broadcasted_iota(jnp.int32, (W, W), 1)
            s_cols = (jnp.abs(wi - wj) == 1).astype(jnp.float32)

            def neighbours(x):   # (H, W) -> 4-neighbour sum, zero ("constant") bc
                return (jnp.dot(s_rows, x,
                                preferred_element_type=jnp.float32,
                                precision=jax.lax.Precision.HIGHEST)
                        + jnp.dot(x, s_cols,
                                  preferred_element_type=jnp.float32,
                                  precision=jax.lax.Precision.HIGHEST))
        else:
            row = jax.lax.broadcasted_iota(jnp.int32, (H, W), 0)
            col = jax.lax.broadcasted_iota(jnp.int32, (H, W), 1)
            not_top = (row != 0).astype(jnp.float32)
            not_bot = (row != H - 1).astype(jnp.float32)
            not_left = (col != 0).astype(jnp.float32)
            not_right = (col != W - 1).astype(jnp.float32)

            def neighbours(x):   # roll + hoisted multiplicative edge masks
                up = pltpu.roll(x, shift=1, axis=0) * not_top            # x[i-1, j]
                down = pltpu.roll(x, shift=H - 1, axis=0) * not_bot      # x[i+1, j]
                left = pltpu.roll(x, shift=1, axis=1) * not_left         # x[i, j-1]
                right = pltpu.roll(x, shift=W - 1, axis=1) * not_right   # x[i, j+1]
                return up + down + left + right

        # ---- per-image erosion chains (static unroll over the block) ----
        for b in range(bt):
            p = pred_ref[b, 0].astype(jnp.float32)      # (H, W)
            t = target_ref[b, 0].astype(jnp.float32)
            cur = (p - t) ** 2                          # bound = (pred - target)^2
            acc = jnp.zeros((H, W), jnp.float32)

            for k in range(erosions):
                # convolve(bound, cross * 0.2, mode='constant', cval=0.0)
                dilation = 0.2 * (cur + neighbours(cur))
                # erosion = max(dilation - 0.5, 0)
                erosion = jnp.maximum(dilation - 0.5, 0.0)
                # per-image min-max normalization iff ptp != 0
                mx = jnp.max(erosion, keepdims=True)
                mn = jnp.min(erosion, keepdims=True)
                ptp = mx - mn
                has_range = ptp > 0.0
                inv = pl.reciprocal(jnp.where(has_range, ptp, 1.0), approx=True)
                erosion = jnp.where(has_range, (erosion - mn) * inv, erosion)
                # eroded += erosion * (k + 1) ** alpha
                acc = acc + erosion * weights[k]
                cur = erosion

            # Only a per-image scalar goes back to HBM (no full-map writeback);
            # broadcast into a lane-dense (8, 128) tile so the store is a
            # full-width vst rather than a masked narrow-lane store.
            out_ref[b] = jnp.broadcast_to(jnp.sum(acc, keepdims=True), (8, 128))

    return kernel


def hausdorff_er_loss(pred, target, *, alpha=ALPHA, erosions=EROSIONS):
    """2D HausdorffERLoss forward: pred/target (B, 1, H, W) -> scalar loss."""
    assert pred.ndim == 4, "Only the 2D (b, 1, x, y) path is implemented"
    assert pred.shape == target.shape, "pred/target must have the same shape"
    assert pred.shape[1] == 1, "Uses one binary channel"
    B, C, H, W = pred.shape

    use_mxu = (H >= 128) and (W >= 128)   # MXU stencil pays off for large planes
    bt = _pick_block_batch(
        B, H, W, pred.dtype.itemsize + target.dtype.itemsize, use_mxu)
    grid = (B // bt,)

    per_image = pl.pallas_call(
        _make_kernel(bt, H, W, erosions, alpha, use_mxu),
        out_shape=jax.ShapeDtypeStruct((B, 8, 128), jnp.float32),
        grid_spec=pltpu.PrefetchScalarGridSpec(
            num_scalar_prefetch=0,
            grid=grid,
            in_specs=[
                pl.BlockSpec((bt, 1, H, W), lambda b: (b, 0, 0, 0)),
                pl.BlockSpec((bt, 1, H, W), lambda b: (b, 0, 0, 0)),
            ],
            out_specs=pl.BlockSpec((bt, 8, 128), lambda b: (b, 0, 0)),
        ),
        compiler_params=pltpu.CompilerParams(
            dimension_semantics=("parallel",),
            vmem_limit_bytes=_VMEM_LIMIT_BYTES,
        ),
    )(pred, target)   # no wrapper-side astype: the kernel casts to f32 itself

    # per-image sums live at [:, 0, 0]; final scalar mean over (B, 1, H, W).
    return jnp.sum(per_image[:, 0, 0]) / jnp.float32(B * C * H * W)


def _reference_loss(pred, target, alpha=ALPHA, erosions=EROSIONS):
    """Pure-JAX reference mirroring the PyTorch/scipy forward (for validation)."""
    p = pred.astype(jnp.float32)[:, 0]
    t = target.astype(jnp.float32)[:, 0]
    cur = (p - t) ** 2
    acc = jnp.zeros_like(cur)
    for k in range(erosions):
        pad = jnp.pad(cur, ((0, 0), (1, 1), (1, 1)))
        dil = 0.2 * (cur + pad[:, :-2, 1:-1] + pad[:, 2:, 1:-1]
                     + pad[:, 1:-1, :-2] + pad[:, 1:-1, 2:])
        ero = jnp.maximum(dil - 0.5, 0.0)
        mx = ero.max(axis=(1, 2), keepdims=True)
        mn = ero.min(axis=(1, 2), keepdims=True)
        ptp = mx - mn
        ero = jnp.where(ptp > 0, (ero - mn) / jnp.where(ptp > 0, ptp, 1.0), ero)
        acc = acc + ero * float((k + 1) ** alpha)
        cur = ero
    return acc.mean()


if __name__ == "__main__":
    key = jax.random.PRNGKey(0)
    kp, kt = jax.random.split(key)
    B, C, H, W = 2, 1, 16, 16
    # Binary foreground/background masks, as the module's docstring specifies.
    pred = (jax.random.uniform(kp, (B, C, H, W)) > 0.5).astype(jnp.float32)
    target = (jax.random.uniform(kt, (B, C, H, W)) > 0.5).astype(jnp.float32)

    loss = jax.jit(hausdorff_er_loss)(pred, target)
    jax.block_until_ready(loss)

    ref = _reference_loss(pred, target)
    assert loss.shape == () and bool(jnp.isfinite(loss))
    assert abs(float(loss) - float(ref)) <= 1e-2 * max(abs(float(ref)), 1.0), (
        float(loss), float(ref))
    print("KERNEL_OK")
</pallas_src>

<mosaic_0001>
module attributes {stable_mosaic.version = 11 : i64} {
  func.func @kernel(%arg0: i32, %arg1: memref<1x1x16x16xf32, #tpu.memory_space<vmem>>, %arg2: memref<1x1x16x16xf32, #tpu.memory_space<vmem>>, %arg3: memref<1x8x128xf32, #tpu.memory_space<vmem>>) attributes {dimension_semantics = [#tpu.dimension_semantics<parallel>], iteration_bounds = array<i64: 2>, scalar_prefetch = 0 : i64, scratch_operands = 0 : i64, tpu.core_type = #tpu.core_type<tc>, window_params = [{transform_indices = @transform_0, window_bounds = array<i64: 1, 1, 16, 16>}, {transform_indices = @transform_1, window_bounds = array<i64: 1, 1, 16, 16>}, {transform_indices = @transform_2, window_bounds = array<i64: 1, 8, 128>}]} {
    %0 = tpu.iota {dimensions = array<i32: 0>} : vector<16x16xi32>
    %1 = tpu.iota {dimensions = array<i32: 1>} : vector<16x16xi32>
    %c0_i32 = arith.constant 0 : i32
    %2 = vector.broadcast %c0_i32 : i32 to vector<16x16xi32>
    %3 = arith.cmpi ne, %0, %2 : vector<16x16xi32>
    %4 = arith.extui %3 : vector<16x16xi1> to vector<16x16xi32>
    %5 = arith.sitofp %4 : vector<16x16xi32> to vector<16x16xf32>
    %c15_i32 = arith.constant 15 : i32
    %6 = vector.broadcast %c15_i32 : i32 to vector<16x16xi32>
    %7 = arith.cmpi ne, %0, %6 : vector<16x16xi32>
    %8 = arith.extui %7 : vector<16x16xi1> to vector<16x16xi32>
    %9 = arith.sitofp %8 : vector<16x16xi32> to vector<16x16xf32>
    %c0_i32_0 = arith.constant 0 : i32
    %10 = vector.broadcast %c0_i32_0 : i32 to vector<16x16xi32>
    %11 = arith.cmpi ne, %1, %10 : vector<16x16xi32>
    %12 = arith.extui %11 : vector<16x16xi1> to vector<16x16xi32>
    %13 = arith.sitofp %12 : vector<16x16xi32> to vector<16x16xf32>
    %c15_i32_1 = arith.constant 15 : i32
    %14 = vector.broadcast %c15_i32_1 : i32 to vector<16x16xi32>
    %15 = arith.cmpi ne, %1, %14 : vector<16x16xi32>
    %16 = arith.extui %15 : vector<16x16xi1> to vector<16x16xi32>
    %17 = arith.sitofp %16 : vector<16x16xi32> to vector<16x16xf32>
    %c0 = arith.constant 0 : index
    %c0_2 = arith.constant 0 : index
    %c0_3 = arith.constant 0 : index
    %c0_4 = arith.constant 0 : index
    %18 = vector.load %arg1[%c0, %c0_2, %c0_3, %c0_4] : memref<1x1x16x16xf32, #tpu.memory_space<vmem>>, vector<1x1x16x16xf32>
    %19 = vector.shape_cast %18 : vector<1x1x16x16xf32> to vector<16x16xf32>
    %c0_5 = arith.constant 0 : index
    %c0_6 = arith.constant 0 : index
    %c0_7 = arith.constant 0 : index
    %c0_8 = arith.constant 0 : index
    %20 = vector.load %arg2[%c0_5, %c0_6, %c0_7, %c0_8] : memref<1x1x16x16xf32, #tpu.memory_space<vmem>>, vector<1x1x16x16xf32>
    %21 = vector.shape_cast %20 : vector<1x1x16x16xf32> to vector<16x16xf32>
    %22 = arith.subf %19, %21 : vector<16x16xf32>
    %23 = arith.mulf %22, %22 : vector<16x16xf32>
    %cst = arith.constant 0.000000e+00 : f32
    %24 = vector.broadcast %cst : f32 to vector<16x16xf32>
    %c1_i32 = arith.constant 1 : i32
    %25 = tpu.dynamic_rotate %23 by %c1_i32 dim 0 : vector<16x16xf32>, i32 -> vector<16x16xf32>
    %26 = arith.mulf %25, %5 : vector<16x16xf32>
    %c15_i32_9 = arith.constant 15 : i32
    %27 = tpu.dynamic_rotate %23 by %c15_i32_9 dim 0 : vector<16x16xf32>, i32 -> vector<16x16xf32>
    %28 = arith.mulf %27, %9 : vector<16x16xf32>
    %c1_i32_10 = arith.constant 1 : i32
    %29 = tpu.dynamic_rotate %23 by %c1_i32_10 dim 1 : vector<16x16xf32>, i32 -> vector<16x16xf32>
    %30 = arith.mulf %29, %13 : vector<16x16xf32>
    %c15_i32_11 = arith.constant 15 : i32
    %31 = tpu.dynamic_rotate %23 by %c15_i32_11 dim 1 : vector<16x16xf32>, i32 -> vector<16x16xf32>
    %32 = arith.mulf %31, %17 : vector<16x16xf32>
    %33 = arith.addf %26, %28 : vector<16x16xf32>
    %34 = arith.addf %33, %30 : vector<16x16xf32>
    %35 = arith.addf %34, %32 : vector<16x16xf32>
    %36 = arith.addf %23, %35 : vector<16x16xf32>
    %cst_12 = arith.constant 2.000000e-01 : f32
    %37 = vector.broadcast %cst_12 : f32 to vector<16x16xf32>
    %38 = arith.mulf %37, %36 : vector<16x16xf32>
    %cst_13 = arith.constant 5.000000e-01 : f32
    %39 = vector.broadcast %cst_13 : f32 to vector<16x16xf32>
    %40 = arith.subf %38, %39 : vector<16x16xf32>
    %cst_14 = arith.constant 0.000000e+00 : f32
    %41 = vector.broadcast %cst_14 : f32 to vector<16x16xf32>
    %42 = arith.maximumf %40, %41 : vector<16x16xf32>
    %43 = vector.shape_cast %42 : vector<16x16xf32> to vector<1x16x16xf32>
    %cst_15 = arith.constant dense<0xFF800000> : vector<1xf32>
    %44 = vector.multi_reduction <maximumf>, %43, %cst_15 [1, 2] : vector<1x16x16xf32> to vector<1xf32>
    %45 = vector.shape_cast %44 : vector<1xf32> to vector<1x1x1xf32>
    %46 = vector.extract %45[0, 0, 0] : f32 from vector<1x1x1xf32>
    %47 = vector.broadcast %46 : f32 to vector<1x1xf32>
    %48 = vector.shape_cast %42 : vector<16x16xf32> to vector<1x16x16xf32>
    %cst_16 = arith.constant dense<0x7F800000> : vector<1xf32>
    %49 = vector.multi_reduction <minimumf>, %48, %cst_16 [1, 2] : vector<1x16x16xf32> to vector<1xf32>
    %50 = vector.shape_cast %49 : vector<1xf32> to vector<1x1x1xf32>
    %51 = vector.extract %50[0, 0, 0] : f32 from vector<1x1x1xf32>
    %52 = vector.broadcast %51 : f32 to vector<1x1xf32>
    %53 = arith.subf %47, %52 : vector<1x1xf32>
    %cst_17 = arith.constant 0.000000e+00 : f32
    %54 = vector.broadcast %cst_17 : f32 to vector<1x1xf32>
    %55 = arith.cmpf ogt, %53, %54 : vector<1x1xf32>
    %cst_18 = arith.constant 1.000000e+00 : f32
    %56 = vector.broadcast %cst_18 : f32 to vector<1x1xf32>
    %57 = arith.select %55, %53, %56 : vector<1x1xi1>, vector<1x1xf32>
    %58 = tpu.reciprocal %57 {approx = true} : vector<1x1xf32> -> vector<1x1xf32>
    %59 = vector.broadcast %52 : vector<1x1xf32> to vector<16x16xf32>
    %60 = arith.subf %42, %59 : vector<16x16xf32>
    %61 = vector.broadcast %58 : vector<1x1xf32> to vector<16x16xf32>
    %62 = arith.mulf %60, %61 : vector<16x16xf32>
    %63 = vector.shape_cast %55 : vector<1x1xi1> to vector<1x1xi1>
    %64 = vector.broadcast %63 : vector<1x1xi1> to vector<16x16xi1>
    %65 = arith.select %64, %62, %42 : vector<16x16xi1>, vector<16x16xf32>
    %cst_19 = arith.constant 1.000000e+00 : f32
    %66 = vector.broadcast %cst_19 : f32 to vector<16x16xf32>
    %67 = arith.mulf %65, %66 : vector<16x16xf32>
    %68 = arith.addf %24, %67 : vector<16x16xf32>
    %c1_i32_20 = arith.constant 1 : i32
    %69 = tpu.dynamic_rotate %65 by %c1_i32_20 dim 0 : vector<16x16xf32>, i32 -> vector<16x16xf32>
    %70 = arith.mulf %69, %5 : vector<16x16xf32>
    %c15_i32_21 = arith.constant 15 : i32
    %71 = tpu.dynamic_rotate %65 by %c15_i32_21 dim 0 : vector<16x16xf32>, i32 -> vector<16x16xf32>
    %72 = arith.mulf %71, %9 : vector<16x16xf32>
    %c1_i32_22 = arith.constant 1 : i32
    %73 = tpu.dynamic_rotate %65 by %c1_i32_22 dim 1 : vector<16x16xf32>, i32 -> vector<16x16xf32>
    %74 = arith.mulf %73, %13 : vector<16x16xf32>
    %c15_i32_23 = arith.constant 15 : i32
    %75 = tpu.dynamic_rotate %65 by %c15_i32_23 dim 1 : vector<16x16xf32>, i32 -> vector<16x16xf32>
    %76 = arith.mulf %75, %17 : vector<16x16xf32>
    %77 = arith.addf %70, %72 : vector<16x16xf32>
    %78 = arith.addf %77, %74 : vector<16x16xf32>
    %79 = arith.addf %78, %76 : vector<16x16xf32>
    %80 = arith.addf %65, %79 : vector<16x16xf32>
    %cst_24 = arith.constant 2.000000e-01 : f32
    %81 = vector.broadcast %cst_24 : f32 to vector<16x16xf32>
    %82 = arith.mulf %81, %80 : vector<16x16xf32>
    %cst_25 = arith.constant 5.000000e-01 : f32
    %83 = vector.broadcast %cst_25 : f32 to vector<16x16xf32>
    %84 = arith.subf %82, %83 : vector<16x16xf32>
    %cst_26 = arith.constant 0.000000e+00 : f32
    %85 = vector.broadcast %cst_26 : f32 to vector<16x16xf32>
    %86 = arith.maximumf %84, %85 : vector<16x16xf32>
    %87 = vector.shape_cast %86 : vector<16x16xf32> to vector<1x16x16xf32>
    %cst_27 = arith.constant dense<0xFF800000> : vector<1xf32>
    %88 = vector.multi_reduction <maximumf>, %87, %cst_27 [1, 2] : vector<1x16x16xf32> to vector<1xf32>
    %89 = vector.shape_cast %88 : vector<1xf32> to vector<1x1x1xf32>
    %90 = vector.extract %89[0, 0, 0] : f32 from vector<1x1x1xf32>
    %91 = vector.broadcast %90 : f32 to vector<1x1xf32>
    %92 = vector.shape_cast %86 : vector<16x16xf32> to vector<1x16x16xf32>
    %cst_28 = arith.constant dense<0x7F800000> : vector<1xf32>
    %93 = vector.multi_reduction <minimumf>, %92, %cst_28 [1, 2] : vector<1x16x16xf32> to vector<1xf32>
    %94 = vector.shape_cast %93 : vector<1xf32> to vector<1x1x1xf32>
    %95 = vector.extract %94[0, 0, 0] : f32 from vector<1x1x1xf32>
    %96 = vector.broadcast %95 : f32 to vector<1x1xf32>
    %97 = arith.subf %91, %96 : vector<1x1xf32>
    %cst_29 = arith.constant 0.000000e+00 : f32
    %98 = vector.broadcast %cst_29 : f32 to vector<1x1xf32>
    %99 = arith.cmpf ogt, %97, %98 : vector<1x1xf32>
    %cst_30 = arith.constant 1.000000e+00 : f32
    %100 = vector.broadcast %cst_30 : f32 to vector<1x1xf32>
    %101 = arith.select %99, %97, %100 : vector<1x1xi1>, vector<1x1xf32>
    %102 = tpu.reciprocal %101 {approx = true} : vector<1x1xf32> -> vector<1x1xf32>
    %103 = vector.broadcast %96 : vector<1x1xf32> to vector<16x16xf32>
    %104 = arith.subf %86, %103 : vector<16x16xf32>
    %105 = vector.broadcast %102 : vector<1x1xf32> to vector<16x16xf32>
    %106 = arith.mulf %104, %105 : vector<16x16xf32>
    %107 = vector.shape_cast %99 : vector<1x1xi1> to vector<1x1xi1>
    %108 = vector.broadcast %107 : vector<1x1xi1> to vector<16x16xi1>
    %109 = arith.select %108, %106, %86 : vector<16x16xi1>, vector<16x16xf32>
    %cst_31 = arith.constant 4.000000e+00 : f32
    %110 = vector.broadcast %cst_31 : f32 to vector<16x16xf32>
    %111 = arith.mulf %109, %110 : vector<16x16xf32>
    %112 = arith.addf %68, %111 : vector<16x16xf32>
    %c1_i32_32 = arith.constant 1 : i32
    %113 = tpu.dynamic_rotate %109 by %c1_i32_32 dim 0 : vector<16x16xf32>, i32 -> vector<16x16xf32>
    %114 = arith.mulf %113, %5 : vector<16x16xf32>
    %c15_i32_33 = arith.constant 15 : i32
    %115 = tpu.dynamic_rotate %109 by %c15_i32_33 dim 0 : vector<16x16xf32>, i32 -> vector<16x16xf32>
    %116 = arith.mulf %115, %9 : vector<16x16xf32>
    %c1_i32_34 = arith.constant 1 : i32
    %117 = tpu.dynamic_rotate %109 by %c1_i32_34 dim 1 : vector<16x16xf32>, i32 -> vector<16x16xf32>
    %118 = arith.mulf %117, %13 : vector<16x16xf32>
    %c15_i32_35 = arith.constant 15 : i32
    %119 = tpu.dynamic_rotate %109 by %c15_i32_35 dim 1 : vector<16x16xf32>, i32 -> vector<16x16xf32>
    %120 = arith.mulf %119, %17 : vector<16x16xf32>
    %121 = arith.addf %114, %116 : vector<16x16xf32>
    %122 = arith.addf %121, %118 : vector<16x16xf32>
    %123 = arith.addf %122, %120 : vector<16x16xf32>
    %124 = arith.addf %109, %123 : vector<16x16xf32>
    %cst_36 = arith.constant 2.000000e-01 : f32
    %125 = vector.broadcast %cst_36 : f32 to vector<16x16xf32>
    %126 = arith.mulf %125, %124 : vector<16x16xf32>
    %cst_37 = arith.constant 5.000000e-01 : f32
    %127 = vector.broadcast %cst_37 : f32 to vector<16x16xf32>
    %128 = arith.subf %126, %127 : vector<16x16xf32>
    %cst_38 = arith.constant 0.000000e+00 : f32
    %129 = vector.broadcast %cst_38 : f32 to vector<16x16xf32>
    %130 = arith.maximumf %128, %129 : vector<16x16xf32>
    %131 = vector.shape_cast %130 : vector<16x16xf32> to vector<1x16x16xf32>
    %cst_39 = arith.constant dense<0xFF800000> : vector<1xf32>
    %132 = vector.multi_reduction <maximumf>, %131, %cst_39 [1, 2] : vector<1x16x16xf32> to vector<1xf32>
    %133 = vector.shape_cast %132 : vector<1xf32> to vector<1x1x1xf32>
    %134 = vector.extract %133[0, 0, 0] : f32 from vector<1x1x1xf32>
    %135 = vector.broadcast %134 : f32 to vector<1x1xf32>
    %136 = vector.shape_cast %130 : vector<16x16xf32> to vector<1x16x16xf32>
    %cst_40 = arith.constant dense<0x7F800000> : vector<1xf32>
    %137 = vector.multi_reduction <minimumf>, %136, %cst_40 [1, 2] : vector<1x16x16xf32> to vector<1xf32>
    %138 = vector.shape_cast %137 : vector<1xf32> to vector<1x1x1xf32>
    %139 = vector.extract %138[0, 0, 0] : f32 from vector<1x1x1xf32>
    %140 = vector.broadcast %139 : f32 to vector<1x1xf32>
    %141 = arith.subf %135, %140 : vector<1x1xf32>
    %cst_41 = arith.constant 0.000000e+00 : f32
    %142 = vector.broadcast %cst_41 : f32 to vector<1x1xf32>
    %143 = arith.cmpf ogt, %141, %142 : vector<1x1xf32>
    %cst_42 = arith.constant 1.000000e+00 : f32
    %144 = vector.broadcast %cst_42 : f32 to vector<1x1xf32>
    %145 = arith.select %143, %141, %144 : vector<1x1xi1>, vector<1x1xf32>
    %146 = tpu.reciprocal %145 {approx = true} : vector<1x1xf32> -> vector<1x1xf32>
    %147 = vector.broadcast %140 : vector<1x1xf32> to vector<16x16xf32>
    %148 = arith.subf %130, %147 : vector<16x16xf32>
    %149 = vector.broadcast %146 : vector<1x1xf32> to vector<16x16xf32>
    %150 = arith.mulf %148, %149 : vector<16x16xf32>
    %151 = vector.shape_cast %143 : vector<1x1xi1> to vector<1x1xi1>
    %152 = vector.broadcast %151 : vector<1x1xi1> to vector<16x16xi1>
    %153 = arith.select %152, %150, %130 : vector<16x16xi1>, vector<16x16xf32>
    %cst_43 = arith.constant 9.000000e+00 : f32
    %154 = vector.broadcast %cst_43 : f32 to vector<16x16xf32>
    %155 = arith.mulf %153, %154 : vector<16x16xf32>
    %156 = arith.addf %112, %155 : vector<16x16xf32>
    %c1_i32_44 = arith.constant 1 : i32
    %157 = tpu.dynamic_rotate %153 by %c1_i32_44 dim 0 : vector<16x16xf32>, i32 -> vector<16x16xf32>
    %158 = arith.mulf %157, %5 : vector<16x16xf32>
    %c15_i32_45 = arith.constant 15 : i32
    %159 = tpu.dynamic_rotate %153 by %c15_i32_45 dim 0 : vector<16x16xf32>, i32 -> vector<16x16xf32>
    %160 = arith.mulf %159, %9 : vector<16x16xf32>
    %c1_i32_46 = arith.constant 1 : i32
    %161 = tpu.dynamic_rotate %153 by %c1_i32_46 dim 1 : vector<16x16xf32>, i32 -> vector<16x16xf32>
    %162 = arith.mulf %161, %13 : vector<16x16xf32>
    %c15_i32_47 = arith.constant 15 : i32
    %163 = tpu.dynamic_rotate %153 by %c15_i32_47 dim 1 : vector<16x16xf32>, i32 -> vector<16x16xf32>
    %164 = arith.mulf %163, %17 : vector<16x16xf32>
    %165 = arith.addf %158, %160 : vector<16x16xf32>
    %166 = arith.addf %165, %162 : vector<16x16xf32>
    %167 = arith.addf %166, %164 : vector<16x16xf32>
    %168 = arith.addf %153, %167 : vector<16x16xf32>
    %cst_48 = arith.constant 2.000000e-01 : f32
    %169 = vector.broadcast %cst_48 : f32 to vector<16x16xf32>
    %170 = arith.mulf %169, %168 : vector<16x16xf32>
    %cst_49 = arith.constant 5.000000e-01 : f32
    %171 = vector.broadcast %cst_49 : f32 to vector<16x16xf32>
    %172 = arith.subf %170, %171 : vector<16x16xf32>
    %cst_50 = arith.constant 0.000000e+00 : f32
    %173 = vector.broadcast %cst_50 : f32 to vector<16x16xf32>
    %174 = arith.maximumf %172, %173 : vector<16x16xf32>
    %175 = vector.shape_cast %174 : vector<16x16xf32> to vector<1x16x16xf32>
    %cst_51 = arith.constant dense<0xFF800000> : vector<1xf32>
    %176 = vector.multi_reduction <maximumf>, %175, %cst_51 [1, 2] : vector<1x16x16xf32> to vector<1xf32>
    %177 = vector.shape_cast %176 : vector<1xf32> to vector<1x1x1xf32>
    %178 = vector.extract %177[0, 0, 0] : f32 from vector<1x1x1xf32>
    %179 = vector.broadcast %178 : f32 to vector<1x1xf32>
    %180 = vector.shape_cast %174 : vector<16x16xf32> to vector<1x16x16xf32>
    %cst_52 = arith.constant dense<0x7F800000> : vector<1xf32>
    %181 = vector.multi_reduction <minimumf>, %180, %cst_52 [1, 2] : vector<1x16x16xf32> to vector<1xf32>
    %182 = vector.shape_cast %181 : vector<1xf32> to vector<1x1x1xf32>
    %183 = vector.extract %182[0, 0, 0] : f32 from vector<1x1x1xf32>
    %184 = vector.broadcast %183 : f32 to vector<1x1xf32>
    %185 = arith.subf %179, %184 : vector<1x1xf32>
    %cst_53 = arith.constant 0.000000e+00 : f32
    %186 = vector.broadcast %cst_53 : f32 to vector<1x1xf32>
    %187 = arith.cmpf ogt, %185, %186 : vector<1x1xf32>
    %cst_54 = arith.constant 1.000000e+00 : f32
    %188 = vector.broadcast %cst_54 : f32 to vector<1x1xf32>
    %189 = arith.select %187, %185, %188 : vector<1x1xi1>, vector<1x1xf32>
    %190 = tpu.reciprocal %189 {approx = true} : vector<1x1xf32> -> vector<1x1xf32>
    %191 = vector.broadcast %184 : vector<1x1xf32> to vector<16x16xf32>
    %192 = arith.subf %174, %191 : vector<16x16xf32>
    %193 = vector.broadcast %190 : vector<1x1xf32> to vector<16x16xf32>
    %194 = arith.mulf %192, %193 : vector<16x16xf32>
    %195 = vector.shape_cast %187 : vector<1x1xi1> to vector<1x1xi1>
    %196 = vector.broadcast %195 : vector<1x1xi1> to vector<16x16xi1>
    %197 = arith.select %196, %194, %174 : vector<16x16xi1>, vector<16x16xf32>
    %cst_55 = arith.constant 1.600000e+01 : f32
    %198 = vector.broadcast %cst_55 : f32 to vector<16x16xf32>
    %199 = arith.mulf %197, %198 : vector<16x16xf32>
    %200 = arith.addf %156, %199 : vector<16x16xf32>
    %c1_i32_56 = arith.constant 1 : i32
    %201 = tpu.dynamic_rotate %197 by %c1_i32_56 dim 0 : vector<16x16xf32>, i32 -> vector<16x16xf32>
    %202 = arith.mulf %201, %5 : vector<16x16xf32>
    %c15_i32_57 = arith.constant 15 : i32
    %203 = tpu.dynamic_rotate %197 by %c15_i32_57 dim 0 : vector<16x16xf32>, i32 -> vector<16x16xf32>
    %204 = arith.mulf %203, %9 : vector<16x16xf32>
    %c1_i32_58 = arith.constant 1 : i32
    %205 = tpu.dynamic_rotate %197 by %c1_i32_58 dim 1 : vector<16x16xf32>, i32 -> vector<16x16xf32>
    %206 = arith.mulf %205, %13 : vector<16x16xf32>
    %c15_i32_59 = arith.constant 15 : i32
    %207 = tpu.dynamic_rotate %197 by %c15_i32_59 dim 1 : vector<16x16xf32>, i32 -> vector<16x16xf32>
    %208 = arith.mulf %207, %17 : vector<16x16xf32>
    %209 = arith.addf %202, %204 : vector<16x16xf32>
    %210 = arith.addf %209, %206 : vector<16x16xf32>
    %211 = arith.addf %210, %208 : vector<16x16xf32>
    %212 = arith.addf %197, %211 : vector<16x16xf32>
    %cst_60 = arith.constant 2.000000e-01 : f32
    %213 = vector.broadcast %cst_60 : f32 to vector<16x16xf32>
    %214 = arith.mulf %213, %212 : vector<16x16xf32>
    %cst_61 = arith.constant 5.000000e-01 : f32
    %215 = vector.broadcast %cst_61 : f32 to vector<16x16xf32>
    %216 = arith.subf %214, %215 : vector<16x16xf32>
    %cst_62 = arith.constant 0.000000e+00 : f32
    %217 = vector.broadcast %cst_62 : f32 to vector<16x16xf32>
    %218 = arith.maximumf %216, %217 : vector<16x16xf32>
    %219 = vector.shape_cast %218 : vector<16x16xf32> to vector<1x16x16xf32>
    %cst_63 = arith.constant dense<0xFF800000> : vector<1xf32>
    %220 = vector.multi_reduction <maximumf>, %219, %cst_63 [1, 2] : vector<1x16x16xf32> to vector<1xf32>
    %221 = vector.shape_cast %220 : vector<1xf32> to vector<1x1x1xf32>
    %222 = vector.extract %221[0, 0, 0] : f32 from vector<1x1x1xf32>
    %223 = vector.broadcast %222 : f32 to vector<1x1xf32>
    %224 = vector.shape_cast %218 : vector<16x16xf32> to vector<1x16x16xf32>
    %cst_64 = arith.constant dense<0x7F800000> : vector<1xf32>
    %225 = vector.multi_reduction <minimumf>, %224, %cst_64 [1, 2] : vector<1x16x16xf32> to vector<1xf32>
    %226 = vector.shape_cast %225 : vector<1xf32> to vector<1x1x1xf32>
    %227 = vector.extract %226[0, 0, 0] : f32 from vector<1x1x1xf32>
    %228 = vector.broadcast %227 : f32 to vector<1x1xf32>
    %229 = arith.subf %223, %228 : vector<1x1xf32>
    %cst_65 = arith.constant 0.000000e+00 : f32
    %230 = vector.broadcast %cst_65 : f32 to vector<1x1xf32>
    %231 = arith.cmpf ogt, %229, %230 : vector<1x1xf32>
    %cst_66 = arith.constant 1.000000e+00 : f32
    %232 = vector.broadcast %cst_66 : f32 to vector<1x1xf32>
    %233 = arith.select %231, %229, %232 : vector<1x1xi1>, vector<1x1xf32>
    %234 = tpu.reciprocal %233 {approx = true} : vector<1x1xf32> -> vector<1x1xf32>
    %235 = vector.broadcast %228 : vector<1x1xf32> to vector<16x16xf32>
    %236 = arith.subf %218, %235 : vector<16x16xf32>
    %237 = vector.broadcast %234 : vector<1x1xf32> to vector<16x16xf32>
    %238 = arith.mulf %236, %237 : vector<16x16xf32>
    %239 = vector.shape_cast %231 : vector<1x1xi1> to vector<1x1xi1>
    %240 = vector.broadcast %239 : vector<1x1xi1> to vector<16x16xi1>
    %241 = arith.select %240, %238, %218 : vector<16x16xi1>, vector<16x16xf32>
    %cst_67 = arith.constant 2.500000e+01 : f32
    %242 = vector.broadcast %cst_67 : f32 to vector<16x16xf32>
    %243 = arith.mulf %241, %242 : vector<16x16xf32>
    %244 = arith.addf %200, %243 : vector<16x16xf32>
    %c1_i32_68 = arith.constant 1 : i32
    %245 = tpu.dynamic_rotate %241 by %c1_i32_68 dim 0 : vector<16x16xf32>, i32 -> vector<16x16xf32>
    %246 = arith.mulf %245, %5 : vector<16x16xf32>
    %c15_i32_69 = arith.constant 15 : i32
    %247 = tpu.dynamic_rotate %241 by %c15_i32_69 dim 0 : vector<16x16xf32>, i32 -> vector<16x16xf32>
    %248 = arith.mulf %247, %9 : vector<16x16xf32>
    %c1_i32_70 = arith.constant 1 : i32
    %249 = tpu.dynamic_rotate %241 by %c1_i32_70 dim 1 : vector<16x16xf32>, i32 -> vector<16x16xf32>
    %250 = arith.mulf %249, %13 : vector<16x16xf32>
    %c15_i32_71 = arith.constant 15 : i32
    %251 = tpu.dynamic_rotate %241 by %c15_i32_71 dim 1 : vector<16x16xf32>, i32 -> vector<16x16xf32>
    %252 = arith.mulf %251, %17 : vector<16x16xf32>
    %253 = arith.addf %246, %248 : vector<16x16xf32>
    %254 = arith.addf %253, %250 : vector<16x16xf32>
    %255 = arith.addf %254, %252 : vector<16x16xf32>
    %256 = arith.addf %241, %255 : vector<16x16xf32>
    %cst_72 = arith.constant 2.000000e-01 : f32
    %257 = vector.broadcast %cst_72 : f32 to vector<16x16xf32>
    %258 = arith.mulf %257, %256 : vector<16x16xf32>
    %cst_73 = arith.constant 5.000000e-01 : f32
    %259 = vector.broadcast %cst_73 : f32 to vector<16x16xf32>
    %260 = arith.subf %258, %259 : vector<16x16xf32>
    %cst_74 = arith.constant 0.000000e+00 : f32
    %261 = vector.broadcast %cst_74 : f32 to vector<16x16xf32>
    %262 = arith.maximumf %260, %261 : vector<16x16xf32>
    %263 = vector.shape_cast %262 : vector<16x16xf32> to vector<1x16x16xf32>
    %cst_75 = arith.constant dense<0xFF800000> : vector<1xf32>
    %264 = vector.multi_reduction <maximumf>, %263, %cst_75 [1, 2] : vector<1x16x16xf32> to vector<1xf32>
    %265 = vector.shape_cast %264 : vector<1xf32> to vector<1x1x1xf32>
    %266 = vector.extract %265[0, 0, 0] : f32 from vector<1x1x1xf32>
    %267 = vector.broadcast %266 : f32 to vector<1x1xf32>
    %268 = vector.shape_cast %262 : vector<16x16xf32> to vector<1x16x16xf32>
    %cst_76 = arith.constant dense<0x7F800000> : vector<1xf32>
    %269 = vector.multi_reduction <minimumf>, %268, %cst_76 [1, 2] : vector<1x16x16xf32> to vector<1xf32>
    %270 = vector.shape_cast %269 : vector<1xf32> to vector<1x1x1xf32>
    %271 = vector.extract %270[0, 0, 0] : f32 from vector<1x1x1xf32>
    %272 = vector.broadcast %271 : f32 to vector<1x1xf32>
    %273 = arith.subf %267, %272 : vector<1x1xf32>
    %cst_77 = arith.constant 0.000000e+00 : f32
    %274 = vector.broadcast %cst_77 : f32 to vector<1x1xf32>
    %275 = arith.cmpf ogt, %273, %274 : vector<1x1xf32>
    %cst_78 = arith.constant 1.000000e+00 : f32
    %276 = vector.broadcast %cst_78 : f32 to vector<1x1xf32>
    %277 = arith.select %275, %273, %276 : vector<1x1xi1>, vector<1x1xf32>
    %278 = tpu.reciprocal %277 {approx = true} : vector<1x1xf32> -> vector<1x1xf32>
    %279 = vector.broadcast %272 : vector<1x1xf32> to vector<16x16xf32>
    %280 = arith.subf %262, %279 : vector<16x16xf32>
    %281 = vector.broadcast %278 : vector<1x1xf32> to vector<16x16xf32>
    %282 = arith.mulf %280, %281 : vector<16x16xf32>
    %283 = vector.shape_cast %275 : vector<1x1xi1> to vector<1x1xi1>
    %284 = vector.broadcast %283 : vector<1x1xi1> to vector<16x16xi1>
    %285 = arith.select %284, %282, %262 : vector<16x16xi1>, vector<16x16xf32>
    %cst_79 = arith.constant 3.600000e+01 : f32
    %286 = vector.broadcast %cst_79 : f32 to vector<16x16xf32>
    %287 = arith.mulf %285, %286 : vector<16x16xf32>
    %288 = arith.addf %244, %287 : vector<16x16xf32>
    %c1_i32_80 = arith.constant 1 : i32
    %289 = tpu.dynamic_rotate %285 by %c1_i32_80 dim 0 : vector<16x16xf32>, i32 -> vector<16x16xf32>
    %290 = arith.mulf %289, %5 : vector<16x16xf32>
    %c15_i32_81 = arith.constant 15 : i32
    %291 = tpu.dynamic_rotate %285 by %c15_i32_81 dim 0 : vector<16x16xf32>, i32 -> vector<16x16xf32>
    %292 = arith.mulf %291, %9 : vector<16x16xf32>
    %c1_i32_82 = arith.constant 1 : i32
    %293 = tpu.dynamic_rotate %285 by %c1_i32_82 dim 1 : vector<16x16xf32>, i32 -> vector<16x16xf32>
    %294 = arith.mulf %293, %13 : vector<16x16xf32>
    %c15_i32_83 = arith.constant 15 : i32
    %295 = tpu.dynamic_rotate %285 by %c15_i32_83 dim 1 : vector<16x16xf32>, i32 -> vector<16x16xf32>
    %296 = arith.mulf %295, %17 : vector<16x16xf32>
    %297 = arith.addf %290, %292 : vector<16x16xf32>
    %298 = arith.addf %297, %294 : vector<16x16xf32>
    %299 = arith.addf %298, %296 : vector<16x16xf32>
    %300 = arith.addf %285, %299 : vector<16x16xf32>
    %cst_84 = arith.constant 2.000000e-01 : f32
    %301 = vector.broadcast %cst_84 : f32 to vector<16x16xf32>
    %302 = arith.mulf %301, %300 : vector<16x16xf32>
    %cst_85 = arith.constant 5.000000e-01 : f32
    %303 = vector.broadcast %cst_85 : f32 to vector<16x16xf32>
    %304 = arith.subf %302, %303 : vector<16x16xf32>
    %cst_86 = arith.constant 0.000000e+00 : f32
    %305 = vector.broadcast %cst_86 : f32 to vector<16x16xf32>
    %306 = arith.maximumf %304, %305 : vector<16x16xf32>
    %307 = vector.shape_cast %306 : vector<16x16xf32> to vector<1x16x16xf32>
    %cst_87 = arith.constant dense<0xFF800000> : vector<1xf32>
    %308 = vector.multi_reduction <maximumf>, %307, %cst_87 [1, 2] : vector<1x16x16xf32> to vector<1xf32>
    %309 = vector.shape_cast %308 : vector<1xf32> to vector<1x1x1xf32>
    %310 = vector.extract %309[0, 0, 0] : f32 from vector<1x1x1xf32>
    %311 = vector.broadcast %310 : f32 to vector<1x1xf32>
    %312 = vector.shape_cast %306 : vector<16x16xf32> to vector<1x16x16xf32>
    %cst_88 = arith.constant dense<0x7F800000> : vector<1xf32>
    %313 = vector.multi_reduction <minimumf>, %312, %cst_88 [1, 2] : vector<1x16x16xf32> to vector<1xf32>
    %314 = vector.shape_cast %313 : vector<1xf32> to vector<1x1x1xf32>
    %315 = vector.extract %314[0, 0, 0] : f32 from vector<1x1x1xf32>
    %316 = vector.broadcast %315 : f32 to vector<1x1xf32>
    %317 = arith.subf %311, %316 : vector<1x1xf32>
    %cst_89 = arith.constant 0.000000e+00 : f32
    %318 = vector.broadcast %cst_89 : f32 to vector<1x1xf32>
    %319 = arith.cmpf ogt, %317, %318 : vector<1x1xf32>
    %cst_90 = arith.constant 1.000000e+00 : f32
    %320 = vector.broadcast %cst_90 : f32 to vector<1x1xf32>
    %321 = arith.select %319, %317, %320 : vector<1x1xi1>, vector<1x1xf32>
    %322 = tpu.reciprocal %321 {approx = true} : vector<1x1xf32> -> vector<1x1xf32>
    %323 = vector.broadcast %316 : vector<1x1xf32> to vector<16x16xf32>
    %324 = arith.subf %306, %323 : vector<16x16xf32>
    %325 = vector.broadcast %322 : vector<1x1xf32> to vector<16x16xf32>
    %326 = arith.mulf %324, %325 : vector<16x16xf32>
    %327 = vector.shape_cast %319 : vector<1x1xi1> to vector<1x1xi1>
    %328 = vector.broadcast %327 : vector<1x1xi1> to vector<16x16xi1>
    %329 = arith.select %328, %326, %306 : vector<16x16xi1>, vector<16x16xf32>
    %cst_91 = arith.constant 4.900000e+01 : f32
    %330 = vector.broadcast %cst_91 : f32 to vector<16x16xf32>
    %331 = arith.mulf %329, %330 : vector<16x16xf32>
    %332 = arith.addf %288, %331 : vector<16x16xf32>
    %c1_i32_92 = arith.constant 1 : i32
    %333 = tpu.dynamic_rotate %329 by %c1_i32_92 dim 0 : vector<16x16xf32>, i32 -> vector<16x16xf32>
    %334 = arith.mulf %333, %5 : vector<16x16xf32>
    %c15_i32_93 = arith.constant 15 : i32
    %335 = tpu.dynamic_rotate %329 by %c15_i32_93 dim 0 : vector<16x16xf32>, i32 -> vector<16x16xf32>
    %336 = arith.mulf %335, %9 : vector<16x16xf32>
    %c1_i32_94 = arith.constant 1 : i32
    %337 = tpu.dynamic_rotate %329 by %c1_i32_94 dim 1 : vector<16x16xf32>, i32 -> vector<16x16xf32>
    %338 = arith.mulf %337, %13 : vector<16x16xf32>
    %c15_i32_95 = arith.constant 15 : i32
    %339 = tpu.dynamic_rotate %329 by %c15_i32_95 dim 1 : vector<16x16xf32>, i32 -> vector<16x16xf32>
    %340 = arith.mulf %339, %17 : vector<16x16xf32>
    %341 = arith.addf %334, %336 : vector<16x16xf32>
    %342 = arith.addf %341, %338 : vector<16x16xf32>
    %343 = arith.addf %342, %340 : vector<16x16xf32>
    %344 = arith.addf %329, %343 : vector<16x16xf32>
    %cst_96 = arith.constant 2.000000e-01 : f32
    %345 = vector.broadcast %cst_96 : f32 to vector<16x16xf32>
    %346 = arith.mulf %345, %344 : vector<16x16xf32>
    %cst_97 = arith.constant 5.000000e-01 : f32
    %347 = vector.broadcast %cst_97 : f32 to vector<16x16xf32>
    %348 = arith.subf %346, %347 : vector<16x16xf32>
    %cst_98 = arith.constant 0.000000e+00 : f32
    %349 = vector.broadcast %cst_98 : f32 to vector<16x16xf32>
    %350 = arith.maximumf %348, %349 : vector<16x16xf32>
    %351 = vector.shape_cast %350 : vector<16x16xf32> to vector<1x16x16xf32>
    %cst_99 = arith.constant dense<0xFF800000> : vector<1xf32>
    %352 = vector.multi_reduction <maximumf>, %351, %cst_99 [1, 2] : vector<1x16x16xf32> to vector<1xf32>
    %353 = vector.shape_cast %352 : vector<1xf32> to vector<1x1x1xf32>
    %354 = vector.extract %353[0, 0, 0] : f32 from vector<1x1x1xf32>
    %355 = vector.broadcast %354 : f32 to vector<1x1xf32>
    %356 = vector.shape_cast %350 : vector<16x16xf32> to vector<1x16x16xf32>
    %cst_100 = arith.constant dense<0x7F800000> : vector<1xf32>
    %357 = vector.multi_reduction <minimumf>, %356, %cst_100 [1, 2] : vector<1x16x16xf32> to vector<1xf32>
    %358 = vector.shape_cast %357 : vector<1xf32> to vector<1x1x1xf32>
    %359 = vector.extract %358[0, 0, 0] : f32 from vector<1x1x1xf32>
    %360 = vector.broadcast %359 : f32 to vector<1x1xf32>
    %361 = arith.subf %355, %360 : vector<1x1xf32>
    %cst_101 = arith.constant 0.000000e+00 : f32
    %362 = vector.broadcast %cst_101 : f32 to vector<1x1xf32>
    %363 = arith.cmpf ogt, %361, %362 : vector<1x1xf32>
    %cst_102 = arith.constant 1.000000e+00 : f32
    %364 = vector.broadcast %cst_102 : f32 to vector<1x1xf32>
    %365 = arith.select %363, %361, %364 : vector<1x1xi1>, vector<1x1xf32>
    %366 = tpu.reciprocal %365 {approx = true} : vector<1x1xf32> -> vector<1x1xf32>
    %367 = vector.broadcast %360 : vector<1x1xf32> to vector<16x16xf32>
    %368 = arith.subf %350, %367 : vector<16x16xf32>
    %369 = vector.broadcast %366 : vector<1x1xf32> to vector<16x16xf32>
    %370 = arith.mulf %368, %369 : vector<16x16xf32>
    %371 = vector.shape_cast %363 : vector<1x1xi1> to vector<1x1xi1>
    %372 = vector.broadcast %371 : vector<1x1xi1> to vector<16x16xi1>
    %373 = arith.select %372, %370, %350 : vector<16x16xi1>, vector<16x16xf32>
    %cst_103 = arith.constant 6.400000e+01 : f32
    %374 = vector.broadcast %cst_103 : f32 to vector<16x16xf32>
    %375 = arith.mulf %373, %374 : vector<16x16xf32>
    %376 = arith.addf %332, %375 : vector<16x16xf32>
    %c1_i32_104 = arith.constant 1 : i32
    %377 = tpu.dynamic_rotate %373 by %c1_i32_104 dim 0 : vector<16x16xf32>, i32 -> vector<16x16xf32>
    %378 = arith.mulf %377, %5 : vector<16x16xf32>
    %c15_i32_105 = arith.constant 15 : i32
    %379 = tpu.dynamic_rotate %373 by %c15_i32_105 dim 0 : vector<16x16xf32>, i32 -> vector<16x16xf32>
    %380 = arith.mulf %379, %9 : vector<16x16xf32>
    %c1_i32_106 = arith.constant 1 : i32
    %381 = tpu.dynamic_rotate %373 by %c1_i32_106 dim 1 : vector<16x16xf32>, i32 -> vector<16x16xf32>
    %382 = arith.mulf %381, %13 : vector<16x16xf32>
    %c15_i32_107 = arith.constant 15 : i32
    %383 = tpu.dynamic_rotate %373 by %c15_i32_107 dim 1 : vector<16x16xf32>, i32 -> vector<16x16xf32>
    %384 = arith.mulf %383, %17 : vector<16x16xf32>
    %385 = arith.addf %378, %380 : vector<16x16xf32>
    %386 = arith.addf %385, %382 : vector<16x16xf32>
    %387 = arith.addf %386, %384 : vector<16x16xf32>
    %388 = arith.addf %373, %387 : vector<16x16xf32>
    %cst_108 = arith.constant 2.000000e-01 : f32
    %389 = vector.broadcast %cst_108 : f32 to vector<16x16xf32>
    %390 = arith.mulf %389, %388 : vector<16x16xf32>
    %cst_109 = arith.constant 5.000000e-01 : f32
    %391 = vector.broadcast %cst_109 : f32 to vector<16x16xf32>
    %392 = arith.subf %390, %391 : vector<16x16xf32>
    %cst_110 = arith.constant 0.000000e+00 : f32
    %393 = vector.broadcast %cst_110 : f32 to vector<16x16xf32>
    %394 = arith.maximumf %392, %393 : vector<16x16xf32>
    %395 = vector.shape_cast %394 : vector<16x16xf32> to vector<1x16x16xf32>
    %cst_111 = arith.constant dense<0xFF800000> : vector<1xf32>
    %396 = vector.multi_reduction <maximumf>, %395, %cst_111 [1, 2] : vector<1x16x16xf32> to vector<1xf32>
    %397 = vector.shape_cast %396 : vector<1xf32> to vector<1x1x1xf32>
    %398 = vector.extract %397[0, 0, 0] : f32 from vector<1x1x1xf32>
    %399 = vector.broadcast %398 : f32 to vector<1x1xf32>
    %400 = vector.shape_cast %394 : vector<16x16xf32> to vector<1x16x16xf32>
    %cst_112 = arith.constant dense<0x7F800000> : vector<1xf32>
    %401 = vector.multi_reduction <minimumf>, %400, %cst_112 [1, 2] : vector<1x16x16xf32> to vector<1xf32>
    %402 = vector.shape_cast %401 : vector<1xf32> to vector<1x1x1xf32>
    %403 = vector.extract %402[0, 0, 0] : f32 from vector<1x1x1xf32>
    %404 = vector.broadcast %403 : f32 to vector<1x1xf32>
    %405 = arith.subf %399, %404 : vector<1x1xf32>
    %cst_113 = arith.constant 0.000000e+00 : f32
    %406 = vector.broadcast %cst_113 : f32 to vector<1x1xf32>
    %407 = arith.cmpf ogt, %405, %406 : vector<1x1xf32>
    %cst_114 = arith.constant 1.000000e+00 : f32
    %408 = vector.broadcast %cst_114 : f32 to vector<1x1xf32>
    %409 = arith.select %407, %405, %408 : vector<1x1xi1>, vector<1x1xf32>
    %410 = tpu.reciprocal %409 {approx = true} : vector<1x1xf32> -> vector<1x1xf32>
    %411 = vector.broadcast %404 : vector<1x1xf32> to vector<16x16xf32>
    %412 = arith.subf %394, %411 : vector<16x16xf32>
    %413 = vector.broadcast %410 : vector<1x1xf32> to vector<16x16xf32>
    %414 = arith.mulf %412, %413 : vector<16x16xf32>
    %415 = vector.shape_cast %407 : vector<1x1xi1> to vector<1x1xi1>
    %416 = vector.broadcast %415 : vector<1x1xi1> to vector<16x16xi1>
    %417 = arith.select %416, %414, %394 : vector<16x16xi1>, vector<16x16xf32>
    %cst_115 = arith.constant 8.100000e+01 : f32
    %418 = vector.broadcast %cst_115 : f32 to vector<16x16xf32>
    %419 = arith.mulf %417, %418 : vector<16x16xf32>
    %420 = arith.addf %376, %419 : vector<16x16xf32>
    %c1_i32_116 = arith.constant 1 : i32
    %421 = tpu.dynamic_rotate %417 by %c1_i32_116 dim 0 : vector<16x16xf32>, i32 -> vector<16x16xf32>
    %422 = arith.mulf %421, %5 : vector<16x16xf32>
    %c15_i32_117 = arith.constant 15 : i32
    %423 = tpu.dynamic_rotate %417 by %c15_i32_117 dim 0 : vector<16x16xf32>, i32 -> vector<16x16xf32>
    %424 = arith.mulf %423, %9 : vector<16x16xf32>
    %c1_i32_118 = arith.constant 1 : i32
    %425 = tpu.dynamic_rotate %417 by %c1_i32_118 dim 1 : vector<16x16xf32>, i32 -> vector<16x16xf32>
    %426 = arith.mulf %425, %13 : vector<16x16xf32>
    %c15_i32_119 = arith.constant 15 : i32
    %427 = tpu.dynamic_rotate %417 by %c15_i32_119 dim 1 : vector<16x16xf32>, i32 -> vector<16x16xf32>
    %428 = arith.mulf %427, %17 : vector<16x16xf32>
    %429 = arith.addf %422, %424 : vector<16x16xf32>
    %430 = arith.addf %429, %426 : vector<16x16xf32>
    %431 = arith.addf %430, %428 : vector<16x16xf32>
    %432 = arith.addf %417, %431 : vector<16x16xf32>
    %cst_120 = arith.constant 2.000000e-01 : f32
    %433 = vector.broadcast %cst_120 : f32 to vector<16x16xf32>
    %434 = arith.mulf %433, %432 : vector<16x16xf32>
    %cst_121 = arith.constant 5.000000e-01 : f32
    %435 = vector.broadcast %cst_121 : f32 to vector<16x16xf32>
    %436 = arith.subf %434, %435 : vector<16x16xf32>
    %cst_122 = arith.constant 0.000000e+00 : f32
    %437 = vector.broadcast %cst_122 : f32 to vector<16x16xf32>
    %438 = arith.maximumf %436, %437 : vector<16x16xf32>
    %439 = vector.shape_cast %438 : vector<16x16xf32> to vector<1x16x16xf32>
    %cst_123 = arith.constant dense<0xFF800000> : vector<1xf32>
    %440 = vector.multi_reduction <maximumf>, %439, %cst_123 [1, 2] : vector<1x16x16xf32> to vector<1xf32>
    %441 = vector.shape_cast %440 : vector<1xf32> to vector<1x1x1xf32>
    %442 = vector.extract %441[0, 0, 0] : f32 from vector<1x1x1xf32>
    %443 = vector.broadcast %442 : f32 to vector<1x1xf32>
    %444 = vector.shape_cast %438 : vector<16x16xf32> to vector<1x16x16xf32>
    %cst_124 = arith.constant dense<0x7F800000> : vector<1xf32>
    %445 = vector.multi_reduction <minimumf>, %444, %cst_124 [1, 2] : vector<1x16x16xf32> to vector<1xf32>
    %446 = vector.shape_cast %445 : vector<1xf32> to vector<1x1x1xf32>
    %447 = vector.extract %446[0, 0, 0] : f32 from vector<1x1x1xf32>
    %448 = vector.broadcast %447 : f32 to vector<1x1xf32>
    %449 = arith.subf %443, %448 : vector<1x1xf32>
    %cst_125 = arith.constant 0.000000e+00 : f32
    %450 = vector.broadcast %cst_125 : f32 to vector<1x1xf32>
    %451 = arith.cmpf ogt, %449, %450 : vector<1x1xf32>
    %cst_126 = arith.constant 1.000000e+00 : f32
    %452 = vector.broadcast %cst_126 : f32 to vector<1x1xf32>
    %453 = arith.select %451, %449, %452 : vector<1x1xi1>, vector<1x1xf32>
    %454 = tpu.reciprocal %453 {approx = true} : vector<1x1xf32> -> vector<1x1xf32>
    %455 = vector.broadcast %448 : vector<1x1xf32> to vector<16x16xf32>
    %456 = arith.subf %438, %455 : vector<16x16xf32>
    %457 = vector.broadcast %454 : vector<1x1xf32> to vector<16x16xf32>
    %458 = arith.mulf %456, %457 : vector<16x16xf32>
    %459 = vector.shape_cast %451 : vector<1x1xi1> to vector<1x1xi1>
    %460 = vector.broadcast %459 : vector<1x1xi1> to vector<16x16xi1>
    %461 = arith.select %460, %458, %438 : vector<16x16xi1>, vector<16x16xf32>
    %cst_127 = arith.constant 1.000000e+02 : f32
    %462 = vector.broadcast %cst_127 : f32 to vector<16x16xf32>
    %463 = arith.mulf %461, %462 : vector<16x16xf32>
    %464 = arith.addf %420, %463 : vector<16x16xf32>
    %465 = vector.shape_cast %464 : vector<16x16xf32> to vector<1x16x16xf32>
    %cst_128 = arith.constant dense<0.000000e+00> : vector<1xf32>
    %466 = vector.multi_reduction <add>, %465, %cst_128 [1, 2] : vector<1x16x16xf32> to vector<1xf32>
    %467 = vector.shape_cast %466 : vector<1xf32> to vector<1x1x1xf32>
    %468 = vector.extract %467[0, 0, 0] : f32 from vector<1x1x1xf32>
    %469 = vector.broadcast %468 : f32 to vector<1x1xf32>
    %470 = vector.shape_cast %469 : vector<1x1xf32> to vector<1x1xf32>
    %471 = vector.broadcast %470 : vector<1x1xf32> to vector<8x128xf32>
    %c0_129 = arith.constant 0 : index
    %c0_130 = arith.constant 0 : index
    %c0_131 = arith.constant 0 : index
    %472 = vector.load %arg3[%c0_129, %c0_130, %c0_131] : memref<1x8x128xf32, #tpu.memory_space<vmem>>, vector<1x8x128xf32>
    %473 = vector.shape_cast %472 : vector<1x8x128xf32> to vector<8x128xf32>
    %474 = vector.shape_cast %471 : vector<8x128xf32> to vector<1x8x128xf32>
    tpu.vector_store %arg3[%c0_129, %c0_130, %c0_131], %474 {strides = array<i32>} : memref<1x8x128xf32, #tpu.memory_space<vmem>>, vector<1x8x128xf32>,
    return
  }
  func.func @transform_0(%arg0: i32) -> (i32, i32, i32, i32) {
    %c0_i32 = arith.constant 0 : i32
    %c0_i32_0 = arith.constant 0 : i32
    %c0_i32_1 = arith.constant 0 : i32
    %c0_i32_2 = arith.constant 0 : i32
    return %arg0, %c0_i32, %c0_i32_0, %c0_i32_1 : i32, i32, i32, i32
  }
  func.func @transform_1(%arg0: i32) -> (i32, i32, i32, i32) {
    %c0_i32 = arith.constant 0 : i32
    %c0_i32_0 = arith.constant 0 : i32
    %c0_i32_1 = arith.constant 0 : i32
    %c0_i32_2 = arith.constant 0 : i32
    return %arg0, %c0_i32, %c0_i32_0, %c0_i32_1 : i32, i32, i32, i32
  }
  func.func @transform_2(%arg0: i32) -> (i32, i32, i32) {
    %c0_i32 = arith.constant 0 : i32
    %c0_i32_0 = arith.constant 0 : i32
    %c0_i32_1 = arith.constant 0 : i32
    return %arg0, %c0_i32, %c0_i32_0 : i32, i32, i32
  }
}

</mosaic_0001>

<bundles_post_ra>
// kernel: hausdorff_er_loss.1
= control target key start
LH: loop header
LB: loop body
LE: loop exit
PB: predicated region body
PF: predicated region fallthrough
CT: control target
= control target key end

     0   :  { %7 = vsyncpa [#allocation3], 0  ;;  %s2278_s0 = inlined_call_operand.hbm [shape: f32[2,1,16,16], index: 0, kind: input, shape index: {}]   ;;  %s2279_s1 = inlined_call_operand.hbm [shape: f32[2,1,16,16], index: 1, kind: input, shape index: {}]   ;;  %s2280_s2 = inlined_call_operand.vmem [shape: f32[2,8,128], index: 2, kind: output, shape index: {}]  }
   0x1   :  { %9 = vsyncpa [#allocation3 + $0x1], 0 }
   0x2   :  { %10 = vsyncpa [#allocation5], 0 }
   0x3   :  { %12 = vsyncpa [#allocation5 + $0x1], 0  ;;  %s1621_s9 = smov 0   ;;  %s1623_s10 = smov 0  }
   0x4   :  { %s1625_s11 = smov 0   ;;  %s1627_s12 = smov 0  }
   0x5 LB: > { %s1640_s13 = sadd.s32 4294967295, %s1594_s12   ;;  %s1643_s14 = sadd.s32 1, %s1594_s12   ;;  %s1594_s12 = sphi %s1627_s12, %s2290_s12   ;;  %s1590_s11 = sphi %s1625_s11, %s2289_s11   ;;  %s1586_s10 = sphi %s1623_s10, %s2288_s10   ;;  %s1582_s9 = sphi %s1621_s9, %s2287_s9  }
   0x6   : > { %s22_s15 = ssub.s32 %s1594_s12, %s1643_s14  ;;  %s25_s16 = sadd.s32 1, %s1590_s11 }
   0x7   : > { %p23_p0 = scmp.eq.s32.totalorder %s22_s15, 0  ;;  %p32_p1 = scmp.ne.s32.totalorder %s1590_s11, %s1586_s10 }
   0x8   : > { %p33_p2 = scmp.eq.s32.totalorder %s1594_s12, 0  ;;  %p38_p3 = scmp.ne.s32.totalorder %s1586_s10, %s1582_s9 }
   0x9   : > { %s1653_s17 = scalar_select %p23_p0, %s1590_s11, %s25_s16  }
   0xa   : > { %p34_p4 = por %p33_p2, %p32_p1  ;;  %p39_p5 = scmp.eq.s32.totalorder %s1640_s13, 0 }
   0xb   : > { %p1439_p6 = scmp.lt.s32.totalorder %s1594_s12, 2  ;;  %s1662_s19 = sand.u32 1, %s1590_s11  }
   0xc   : > { %p1657_p7 = por %p39_p5, %p38_p3  ;;  %s1348_s20 = sshll.u32 %s1662_s19, 4 }
   0xd   : > { %s1384_s21 = sshll.u32 %s1594_s12, 8  ;;  %s118_s25 = scalar_lea.vmem [#allocation2], %s1348_s20 }
   0xe   : > { %s2282_s18 = scalar_select %p1657_p7, 1, 0 }
   0xf   : > { %s1671_s24 = scalar_lea.hbm %s2278_s0, %s1384_s21  ;;  %s125_s26 = sshll.u32 %s118_s25, 4  ;;  %s1675_s26 = int_to_ptr.vmem [resolvable:$true] %s125_s26 }
  0x10   : > { %p1677_p8 = pnand %p1439_p6, %p34_p4  ;;  %s115_s28 = scalar_lea.sflag [#allocation3], %s1662_s19 }
  0x11   : > { %s1500_s29 = scalar_lea.hbm %s1671_s24, 256  ;;  %s1505_s4 = scalar_lea.hbm %s2278_s0, 512 }
  0x12   : > { %p1501_p10 = scmp.ne.s32.totalorder %s1671_s24, %s1500_s29  ;;  %p1502_p11 = pneg %p1677_p8 }
  0x13   : > { %p1506_p0 = scmp.lt.s32.totalorder %s1671_s24, %s2278_s0  ;;  %p1507_p1 = scmp.lt.s32.totalorder %s1505_s4, %s1500_s29 }
  0x14   : > { %p1503_p12 = pnand %p1502_p11, %p1501_p10 }
  0x15   : > { %p1508_p2 = por %p1507_p1, %p1506_p0 }
  0x16   : > { %p1504_p13 = pneg %p1503_p12 }
  0x18   : > { %p1509_p3 = pnand %p1508_p2, %p1504_p13 }
  0x1a   : > { %1512 = shalt.err (!%p1509_p3)
}
  0x1b   : > { %s1513_s7 = scalar_lea.vmem %s1675_s26, 256  ;;  %s1596_s8 = smov [#allocation2]  }
  0x1c   : > { %p1514_p4 = scmp.ne.s32.totalorder %s1675_s26, %s1513_s7  ;;  %s1518_s9 = sshll.u32 %s1596_s8, 4  ;;  %s1519_s9 = int_to_ptr.vmem [resolvable:$false] %s1518_s9 }
  0x1d   : > { %s1520_s15 = scalar_lea.vmem %s1519_s9, 512  ;;  %p1521_p10 = scmp.lt.s32.totalorder %s1675_s26, %s1519_s9 }
  0x1e   : > { %p1516_p5 = pnand %p1514_p4, %p1502_p11  ;;  %p1522_p12 = scmp.lt.s32.totalorder %s1520_s15, %s1513_s7 }
  0x20   : > { %p1517_p6 = pneg %p1516_p5  ;;  %p1523_p9 = por %p1522_p12, %p1521_p10 }
  0x22   : > { %p1524_p0 = pnand %p1523_p9, %p1517_p6 }
  0x24   : > { %1527 = shalt.err (!%p1524_p0)
}
  0x25   : > { %s1597_s16 = smov 128   ;;  %s1598_s22 = smov 8  }
  0x26   : > { %1435 = dma.hbm_to_vmem [thread:$0]  (!%p1677_p8), %s1671_s24, 256, %s1675_s26, %s115_s28, %s1597_s16, %s1597_s16, %s1598_s22  }
  0x27   : > { %p154_p9 = scmp.lt.s32.totalorder %s1594_s12, 3  ;;  %s1718_s29 = scalar_lea.hbm %s2279_s1, %s1384_s21 }
  0x28   : > { %p2284_p13 = scmp.ge.s32.totalorder %s1594_s12, 1  ;;  %s139_s3 = scalar_lea.vmem [#allocation4], %s1348_s20 }
  0x29   : > { %s146_s4 = sshll.u32 %s139_s3, 4  ;;  %s136_s24 = scalar_lea.sflag [#allocation5], %s1662_s19  ;;  %s1728_s4 = int_to_ptr.vmem [resolvable:$true] %s146_s4 }
  0x2a   : > { %p1722_p1 = pnand %p2284_p13, %p154_p9  ;;  %s1528_s26 = scalar_lea.hbm %s1718_s29, 256 }
  0x2b   : > { %p1529_p2 = scmp.ne.s32.totalorder %s1718_s29, %s1528_s26  ;;  %s1533_s28 = scalar_lea.hbm %s2279_s1, 512 }
  0x2c   : > { %p1534_p5 = scmp.lt.s32.totalorder %s1718_s29, %s2279_s1  ;;  %p1535_p6 = scmp.lt.s32.totalorder %s1533_s28, %s1528_s26 }
  0x2d   : > { %p1531_p3 = pnand %p1529_p2, %p1502_p11 }
  0x2e   : > { %p1536_p10 = por %p1535_p6, %p1534_p5 }
  0x2f   : > { %p1532_p4 = pneg %p1531_p3 }
  0x31   : > { %p1537_p12 = pnand %p1536_p10, %p1532_p4 }
  0x33   : > { %1540 = shalt.err (!%p1537_p12)
}
  0x34   : > { %s1541_s19 = scalar_lea.vmem %s1728_s4, 256  ;;  %s1599_s20 = smov [#allocation4]  }
  0x35   : > { %p1542_p0 = scmp.ne.s32.totalorder %s1728_s4, %s1541_s19  ;;  %s1546_s7 = sshll.u32 %s1599_s20, 4  ;;  %s1547_s7 = int_to_ptr.vmem [resolvable:$false] %s1546_s7 }
  0x36   : > { %s1548_s8 = scalar_lea.vmem %s1547_s7, 512  ;;  %p1549_p2 = scmp.lt.s32.totalorder %s1728_s4, %s1547_s7 }
  0x37   : > { %p1544_p9 = pnand %p1542_p0, %p1502_p11  ;;  %p1550_p3 = scmp.lt.s32.totalorder %s1548_s8, %s1541_s19 }
  0x39   : > { %p1545_p13 = pneg %p1544_p9  ;;  %p1551_p7 = por %p1550_p3, %p1549_p2 }
  0x3b   : > { %p1552_p5 = pnand %p1551_p7, %p1545_p13 }
  0x3d   : > { %1555 = shalt.err (!%p1552_p5)
}
  0x3e   : > { %1438 = dma.hbm_to_vmem [thread:$0]  (!%p1677_p8), %s1718_s29, 256, %s1728_s4, %s136_s24, %s1597_s16, %s1597_s16, %s1598_s22  }
  0x3f   : > { %158 = sbr.rel (%p1722_p1) target bundleno = 6180 (0x1824), region = 28  ;;  %s160_s9 = sand.u32 (!%p1722_p1), 1, %s1586_s10  }
  0x40   : > { %s1355_s15 = sshll.u32 (!%p1722_p1), %s160_s9, 4  ;;  %s161_s23 = scalar_lea.sflag (!%p1722_p1), [#allocation3], %s160_s9 }
  0x41   : > { %s164_s25 = scalar_lea.vmem (!%p1722_p1), [#allocation2], %s1355_s15  ;;  %p2286_p11 = scmp.ne.s32.totalorder (!%p1722_p1), %s2282_s18, 0 }
  0x44   : > { %1573 = dma.done.wait (%p2286_p11), %s161_s23, 256  }
  0x45   : > { %1575 = vsyncadd (%p2286_p11), %s161_s23, 4294967040  ;;  %s170_s27 = scalar_lea.sflag [#allocation5], %s160_s9  ;;  %s173_s3 = scalar_lea.vmem [#allocation4], %s1355_s15 }
  0x46   : > { %1577 = dma.done.wait (%p2286_p11), %s170_s27, 256  }
  0x47   : > { %1579 = vsyncadd (%p2286_p11), %s170_s27, 4294967040  ;;  %v202_v0 = vlaneseq  ;;  %v1600_v4 = vmov 0.0   ;;  %v225_v7 = vld [vmem:[%s164_s25] sm:$0xff]  ;;  %v226_v9 = vld [vmem:[%s164_s25 + $0x8] sm:$0xff]  ;;  %s1601_s18 = smov 16   ;;  %s1602_s16 = smov 15  }
  0x48   : > { %v227_v8 = vld [vmem:[%s173_s3] sm:$0xff]  ;;  %v228_v12 = vld [vmem:[%s173_s3 + $0x8] sm:$0xff]  ;;  %vm247_vm4 = vcmask 1047680   ;;  %s1603_s22 = smov 1   ;;  %s1604_s29 = smov 113   ;;  %vm302_vm7 = vcmask 130048  }
  0x49   : > { %v1767_v1 = vshrl.u32 %v202_v0, 7  ;;  %v206_v2 = vand.u32 127, %v202_v0  ;;  %v229_v11 = vsub.f32 %v225_v7, %v227_v8  ;;  %v230_v13 = vsub.f32 %v226_v9, %v228_v12  ;;  %s1605_s30 = smov 127   ;;  %p198_p7 = scmp.lt.s32.totalorder %s1640_s13, 1 }
  0x4b   : > { %v204_v3 = vadd.s32 8, %v1767_v1  ;;  %vm207_vm0 = vcmp.ne.s32.totalorder %v1767_v1, 0  ;;  %vm222_vm1 = vcmp.ne.s32.totalorder %v206_v2, 15  ;;  %v231_v14 = vmul.f32 %v229_v11, %v229_v11  ;;  %s2292_s13 = smov (!%p198_p7, %s1640_s13), 1 }
  0x4c   : > { %v1771_v5 = vsel %vm207_vm0, 1.0, %v1600_v4  ;;  %v1361_v6 = vsel %vm222_vm1, 1.0, %v1600_v4  ;;  %v232_v15 = vmul.f32 %v230_v13, %v230_v13  ;;  %vm219_vm3 = vcmp.ne.s32.totalorder %v206_v2, 0 }
  0x4d   : > { %vm214_vm2 = vcmp.ne.s32.totalorder %v204_v3, 15  ;;  %248 = vrot.lane.b32.xlu0 %v231_v14, %s1601_s18  ;;  %v1360_v16 = vsel %vm219_vm3, 1.0, %v1600_v4  ;;  %v233_v32 = vrot.slane %v231_v14, 7  ;;  %vm235_vm5 = vcmp.lt.s32.totalorder %v1767_v1, 1 }
  0x4e   : > { %v1773_v10 = vsel %vm214_vm2, 1.0, %v1600_v4  ;;  %v234_v31 = vrot.slane %v232_v15, 7  ;;  %v241_v33 = vrot.slane %v232_v15, 1  ;;  %v240_v34 = vrot.slane %v231_v14, 1 }
  0x4f   : > { %vm242_vm6 = vcmp.lt.s32.totalorder %v1767_v1, 7 }
  0x50   : > { %v237_v35 = vsel %vm235_vm5, %v234_v31, %v233_v32  ;;  %v244_v36 = vsel %vm242_vm6, %v241_v33, %v240_v34  ;;  %v243_v38 = vsel %vm242_vm6, %v240_v34, %v241_v33  ;;  %v236_v40 = vsel %vm235_vm5, %v233_v32, %v234_v31 }
  0x51   : > { %251 = vrot.lane.b32.xlu0 %v232_v15, %s1601_s18  ;;  %v238_v37 = vmul.f32 %v1771_v5, %v237_v35  ;;  %v246_v39 = vmul.f32 %v1773_v10, %v244_v36 }
  0x53   : > { %v272_v41 = vadd.f32 %v243_v38, %v238_v37  ;;  %v273_v43 = vadd.f32 %v246_v39, %v236_v40 }
  0x55   : > { %261 = vrot.lane.b32.xlu0 %v1360_v16, %s1602_s16 }
  0xbf   : > { %v249_v17 = vpop.permute.xlu0 %248 }
  0xc0   : > { %v250_v18 = vsel %vm247_vm4, %v249_v17, %v231_v14 }
  0xc1   : > { %254 = vrot.lane.b32.xlu1 %v250_v18, %s1601_s18 }
  0xc3   : > { %v252_v19 = vpop.permute.xlu0 %251 }
  0xc4   : > { %v253_v20 = vsel %vm247_vm4, %v252_v19, %v232_v15 }
  0xc5   : > { %256 = vrot.lane.b32.xlu1 %v253_v20, %s1601_s18 }
  0xc7   : > { %v1781_v21 = vpop.permute.xlu0 %261 }
  0xc9   : > { %267 = vrot.lane.b32.xlu1 %v1361_v6, %s1603_s22  ;;  %s1357_s22 = sshll.u32 %s2292_s13, 3 }
 0x133   : > { %v255_v22 = vpop.permute.xlu1 %254 }
 0x134   : > { %v258_v23 = vsel %vm247_vm4, %v255_v22, %v231_v14 }
 0x135   : > { %v264_v24 = vmul.f32 %v1781_v21, %v258_v23 }
 0x137   : > { %v257_v25 = vpop.permute.xlu1 %256  ;;  %276 = vrot.lane.b32.xlu0 %v264_v24, %s1604_s29 }
 0x138   : > { %v259_v26 = vsel %vm247_vm4, %v257_v25, %v232_v15 }
 0x139   : > { %v265_v27 = vmul.f32 %v1781_v21, %v259_v26 }
 0x13b   : > { %v1788_v28 = vpop.permute.xlu1 %267  ;;  %278 = vrot.lane.b32.xlu1 %v265_v27, %s1604_s29 }
 0x13c   : > { %v270_v29 = vmul.f32 %v1788_v28, %v258_v23  ;;  %v271_v30 = vmul.f32 %v1788_v28, %v259_v26 }
 0x13e   : > { %286 = vrot.lane.b32.xlu0 %v270_v29, %s1605_s30 }
 0x13f   : > { %288 = vrot.lane.b32.xlu1 %v271_v30, %s1605_s30 }
 0x1a9   : > { %v277_v42 = vpop.permute.xlu0 %276 }
 0x1aa   : > { %v282_v45 = vadd.f32 %v277_v42, %v272_v41 }
 0x1ad   : > { %v279_v44 = vpop.permute.xlu1 %278 }
 0x1ae   : > { %v283_v46 = vadd.f32 %v279_v44, %v273_v43 }
 0x1b0   : > { %v287_v47 = vpop.permute.xlu0 %286 }
 0x1b1   : > { %v292_v48 = vadd.f32 %v287_v47, %v282_v45  ;;  %v289_v49 = vpop.permute.xlu1 %288 }
 0x1b2   : > { %v293_v50 = vadd.f32 %v289_v49, %v283_v46 }
 0x1b3   : > { %v294_v51 = vadd.f32 %v292_v48, %v231_v14 }
 0x1b4   : > { %v295_v52 = vadd.f32 %v293_v50, %v232_v15 }
 0x1b5   : > { %v296_v53 = vmul.f32 0.2, %v294_v51 }
 0x1b6   : > { %v297_v54 = vmul.f32 0.2, %v295_v52 }
 0x1b7   : > { %v1362_v55 = vadd.f32 -0.5, %v296_v53 }
 0x1b8   : > { %v1363_v56 = vadd.f32 -0.5, %v297_v54 }
 0x1b9   : > { %v300_v57 = vmax.f32 %v1362_v55, 0.0 }
 0x1ba   : > { %v301_v58 = vmax.f32 %v1363_v56, 0.0 }
 0x1bb   : > { %v316_v59 = vsel %vm302_vm7, %v300_v57, inf  ;;  %v303_v60 = vsel %vm302_vm7, %v300_v57, -inf }
 0x1bc   : > { %v317_v61 = vsel %vm302_vm7, %v301_v58, inf  ;;  %v304_v62 = vsel %vm302_vm7, %v301_v58, -inf }
 0x1bd   : > { %v318_v63 = vmin.f32 %v316_v59, %v317_v61  ;;  %v305_v0 = vmax.f32 %v303_v60, %v304_v62 }
 0x1bf   : > { %319 = vmin.xlane.f32.xlu1 %v318_v63  ;;  %306 = vmax.xlane.f32.xlu0 %v305_v0 }
 0x248   : > { %v320_v2 = vpop.xlane.xlu1 %319  ;;  %v307_v3 = vpop.xlane.xlu0 %306 }
 0x249   : > { %v321_v4 = vrot.slane %v320_v2, 4  ;;  %v308_v6 = vrot.slane %v307_v3, 4 }
 0x24b   : > { %v322_v7 = vmin.f32 %v320_v2, %v321_v4  ;;  %v309_v8 = vmax.f32 %v307_v3, %v308_v6 }
 0x24d   : > { %v323_v9 = vrot.slane %v322_v7, 2  ;;  %v310_v11 = vrot.slane %v309_v8, 2 }
 0x24f   : > { %v311_v12 = vmax.f32 %v309_v8, %v310_v11  ;;  %v324_v13 = vmin.f32 %v322_v7, %v323_v9 }
 0x251   : > { %v312_v14 = vrot.slane %v311_v12, 1  ;;  %v325_v15 = vrot.slane %v324_v13, 1 }
 0x253   : > { %v313_v16 = vmax.f32 %v311_v12, %v312_v14  ;;  %v326_v17 = vmin.f32 %v324_v13, %v325_v15 }
 0x255   : > { %1386 = vpush %v313_v16 }
 0x256   : > { %1388 = vpush %v326_v17 }
 0x286   : > { %s1387_s4 = spop %1386 }
 0x287   : > { %v315_v18 = vstv %s1387_s4  ;;  %s1389_s24 = spop %1388  ;;  %s201_s4 = scalar_lea.vmem %s2280_s2, %s1357_s22 }
 0x288   : > { %v328_v19 = vstv %s1389_s24 }
 0x289   : > { %v329_v20 = vsub.f32 %v315_v18, %v328_v19  ;;  %v333_v23 = vsub.f32 %v300_v57, %v328_v19  ;;  %v334_v24 = vsub.f32 %v301_v58, %v328_v19 }
 0x28b   : > { %vm330_vm8 = vcmp.gt.f32.partialorder %v329_v20, 0.0 }
 0x28c   : > { %v331_v22 = vsel %vm330_vm8, %v329_v20, 1.0 }
 0x28d   : > { %1480 = vrcp.f32 %v331_v22 }
 0x29a   : > { %v1481_v25 = vpop.eup %1480 }
 0x29b   : > { %v335_v26 = vmul.f32 %v1481_v25, %v333_v23  ;;  %v336_v27 = vmul.f32 %v1481_v25, %v334_v24 }
 0x29d   : > { %v1811_v29 = vsel %vm330_vm8, %v335_v26, %v300_v57  ;;  %v1813_v30 = vsel %vm330_vm8, %v336_v27, %v301_v58 }
 0x29e   : > { %358 = vrot.lane.b32.xlu1 %v1813_v30, %s1601_s18  ;;  %355 = vrot.lane.b32.xlu0 %v1811_v29, %s1601_s18  ;;  %v343_v43 = vrot.slane %v1811_v29, 7  ;;  %v344_v44 = vrot.slane %v1813_v30, 7  ;;  %v349_v45 = vrot.slane %v1811_v29, 1  ;;  %v350_v46 = vrot.slane %v1813_v30, 1 }
 0x2a0   : > { %v352_v47 = vsel %vm242_vm6, %v350_v46, %v349_v45  ;;  %v346_v48 = vsel %vm235_vm5, %v344_v44, %v343_v43  ;;  %v345_v52 = vsel %vm235_vm5, %v343_v43, %v344_v44  ;;  %v351_v54 = vsel %vm242_vm6, %v349_v45, %v350_v46 }
 0x2a1   : > { %v354_v49 = vmul.f32 %v1773_v10, %v352_v47  ;;  %v347_v50 = vmul.f32 %v1771_v5, %v346_v48 }
 0x2a3   : > { %v372_v55 = vadd.f32 %v354_v49, %v345_v52  ;;  %v371_v56 = vadd.f32 %v351_v54, %v347_v50 }
 0x310   : > { %v359_v31 = vpop.permute.xlu1 %358  ;;  %v356_v32 = vpop.permute.xlu0 %355 }
 0x311   : > { %v360_v33 = vsel %vm247_vm4, %v359_v31, %v1813_v30  ;;  %v357_v34 = vsel %vm247_vm4, %v356_v32, %v1811_v29 }
 0x312   : > { %363 = vrot.lane.b32.xlu1 %v360_v33, %s1601_s18  ;;  %361 = vrot.lane.b32.xlu0 %v357_v34, %s1601_s18 }
 0x384   : > { %v364_v35 = vpop.permute.xlu1 %363  ;;  %v362_v36 = vpop.permute.xlu0 %361 }
 0x385   : > { %v366_v37 = vsel %vm247_vm4, %v364_v35, %v1813_v30  ;;  %v365_v38 = vsel %vm247_vm4, %v362_v36, %v1811_v29 }
 0x386   : > { %v368_v39 = vmul.f32 %v366_v37, %v1781_v21  ;;  %v367_v40 = vmul.f32 %v365_v38, %v1781_v21  ;;  %v370_v41 = vmul.f32 %v366_v37, %v1788_v28  ;;  %v369_v42 = vmul.f32 %v365_v38, %v1788_v28 }
 0x388   : > { %377 = vrot.lane.b32.xlu1 %v368_v39, %s1604_s29  ;;  %375 = vrot.lane.b32.xlu0 %v367_v40, %s1604_s29 }
 0x38c   : > { %387 = vrot.lane.b32.xlu1 %v370_v41, %s1605_s30  ;;  %385 = vrot.lane.b32.xlu0 %v369_v42, %s1605_s30 }
 0x3fa   : > { %v378_v51 = vpop.permute.xlu1 %377  ;;  %v376_v53 = vpop.permute.xlu0 %375 }
 0x3fb   : > { %v382_v57 = vadd.f32 %v378_v51, %v372_v55  ;;  %v381_v58 = vadd.f32 %v376_v53, %v371_v56 }
 0x3fe   : > { %v388_v59 = vpop.permute.xlu1 %387  ;;  %v386_v60 = vpop.permute.xlu0 %385 }
 0x3ff   : > { %v392_v61 = vadd.f32 %v388_v59, %v382_v57  ;;  %v391_v62 = vadd.f32 %v386_v60, %v381_v58 }
 0x401   : > { %v394_v63 = vadd.f32 %v392_v61, %v1813_v30  ;;  %v393_v0 = vadd.f32 %v391_v62, %v1811_v29 }
 0x403   : > { %v396_v2 = vmul.f32 0.2, %v394_v63  ;;  %v395_v3 = vmul.f32 0.2, %v393_v0 }
 0x405   : > { %v1365_v4 = vadd.f32 -0.5, %v396_v2  ;;  %v1364_v6 = vadd.f32 -0.5, %v395_v3 }
 0x407   : > { %v400_v7 = vmax.f32 %v1365_v4, 0.0  ;;  %v399_v8 = vmax.f32 %v1364_v6, 0.0 }
 0x409   : > { %v414_v9 = vsel %vm302_vm7, %v399_v8, inf  ;;  %v415_v11 = vsel %vm302_vm7, %v400_v7, inf  ;;  %v401_v12 = vsel %vm302_vm7, %v399_v8, -inf  ;;  %v402_v13 = vsel %vm302_vm7, %v400_v7, -inf }
 0x40a   : > { %v416_v14 = vmin.f32 %v414_v9, %v415_v11  ;;  %v403_v15 = vmax.f32 %v401_v12, %v402_v13 }
 0x40c   : > { %417 = vmin.xlane.f32.xlu1 %v416_v14  ;;  %404 = vmax.xlane.f32.xlu0 %v403_v15 }
 0x495   : > { %v418_v16 = vpop.xlane.xlu1 %417  ;;  %v405_v17 = vpop.xlane.xlu0 %404 }
 0x496   : > { %v419_v18 = vrot.slane %v418_v16, 4  ;;  %v406_v19 = vrot.slane %v405_v17, 4 }
 0x498   : > { %v420_v20 = vmin.f32 %v418_v16, %v419_v18  ;;  %v407_v22 = vmax.f32 %v405_v17, %v406_v19 }
 0x49a   : > { %v421_v23 = vrot.slane %v420_v20, 2  ;;  %v408_v24 = vrot.slane %v407_v22, 2 }
 0x49c   : > { %v409_v25 = vmax.f32 %v407_v22, %v408_v24  ;;  %v422_v26 = vmin.f32 %v420_v20, %v421_v23 }
 0x49e   : > { %v410_v27 = vrot.slane %v409_v25, 1  ;;  %v423_v31 = vrot.slane %v422_v26, 1 }
 0x4a0   : > { %v411_v32 = vmax.f32 %v409_v25, %v410_v27  ;;  %v424_v33 = vmin.f32 %v422_v26, %v423_v31 }
 0x4a2   : > { %1390 = vpush %v411_v32 }
 0x4a3   : > { %1392 = vpush %v424_v33 }
 0x4d3   : > { %s1391_s26 = spop %1390 }
 0x4d4   : > { %v413_v34 = vstv %s1391_s26  ;;  %s1393_s12 = spop %1392 }
 0x4d5   : > { %v426_v35 = vstv %s1393_s12 }
 0x4d6   : > { %v427_v36 = vsub.f32 %v413_v34, %v426_v35  ;;  %v431_v38 = vsub.f32 %v399_v8, %v426_v35  ;;  %v432_v39 = vsub.f32 %v400_v7, %v426_v35 }
 0x4d8   : > { %vm428_vm9 = vcmp.gt.f32.partialorder %v427_v36, 0.0 }
 0x4d9   : > { %v429_v37 = vsel %vm428_vm9, %v427_v36, 1.0 }
 0x4da   : > { %1482 = vrcp.f32 %v429_v37 }
 0x4e7   : > { %v1483_v40 = vpop.eup %1482 }
 0x4e8   : > { %v433_v41 = vmul.f32 %v1483_v40, %v431_v38  ;;  %v434_v42 = vmul.f32 %v1483_v40, %v432_v39 }
 0x4ea   : > { %v1857_v43 = vsel %vm428_vm9, %v433_v41, %v399_v8  ;;  %v1859_v44 = vsel %vm428_vm9, %v434_v42, %v400_v7 }
 0x4eb   : > { %458 = vrot.lane.b32.xlu1 %v1859_v44, %s1601_s18  ;;  %455 = vrot.lane.b32.xlu0 %v1857_v43, %s1601_s18  ;;  %v443_v57 = vrot.slane %v1857_v43, 7  ;;  %v444_v58 = vrot.slane %v1859_v44, 7  ;;  %v449_v59 = vrot.slane %v1857_v43, 1  ;;  %v450_v60 = vrot.slane %v1859_v44, 1 }
 0x4ed   : > { %v452_v61 = vsel %vm242_vm6, %v450_v60, %v449_v59  ;;  %v446_v62 = vsel %vm235_vm5, %v444_v58, %v443_v57  ;;  %v445_v3 = vsel %vm235_vm5, %v443_v57, %v444_v58  ;;  %v451_v6 = vsel %vm242_vm6, %v449_v59, %v450_v60 }
 0x4ee   : > { %v454_v63 = vmul.f32 %v1773_v10, %v452_v61  ;;  %v447_v0 = vmul.f32 %v1771_v5, %v446_v62 }
 0x4f0   : > { %v472_v7 = vadd.f32 %v454_v63, %v445_v3  ;;  %v471_v8 = vadd.f32 %v451_v6, %v447_v0 }
 0x55d   : > { %v459_v45 = vpop.permute.xlu1 %458  ;;  %v456_v46 = vpop.permute.xlu0 %455 }
 0x55e   : > { %v460_v47 = vsel %vm247_vm4, %v459_v45, %v1859_v44  ;;  %v457_v48 = vsel %vm247_vm4, %v456_v46, %v1857_v43 }
 0x55f   : > { %463 = vrot.lane.b32.xlu1 %v460_v47, %s1601_s18  ;;  %461 = vrot.lane.b32.xlu0 %v457_v48, %s1601_s18 }
 0x5d1   : > { %v464_v49 = vpop.permute.xlu1 %463  ;;  %v462_v50 = vpop.permute.xlu0 %461 }
 0x5d2   : > { %v466_v51 = vsel %vm247_vm4, %v464_v49, %v1859_v44  ;;  %v465_v52 = vsel %vm247_vm4, %v462_v50, %v1857_v43 }
 0x5d3   : > { %v468_v53 = vmul.f32 %v466_v51, %v1781_v21  ;;  %v467_v54 = vmul.f32 %v465_v52, %v1781_v21  ;;  %v470_v55 = vmul.f32 %v466_v51, %v1788_v28  ;;  %v469_v56 = vmul.f32 %v465_v52, %v1788_v28 }
 0x5d5   : > { %477 = vrot.lane.b32.xlu1 %v468_v53, %s1604_s29  ;;  %475 = vrot.lane.b32.xlu0 %v467_v54, %s1604_s29 }
 0x5d9   : > { %487 = vrot.lane.b32.xlu1 %v470_v55, %s1605_s30  ;;  %485 = vrot.lane.b32.xlu0 %v469_v56, %s1605_s30 }
 0x647   : > { %v478_v2 = vpop.permute.xlu1 %477  ;;  %v476_v4 = vpop.permute.xlu0 %475 }
 0x648   : > { %v482_v9 = vadd.f32 %v478_v2, %v472_v7  ;;  %v481_v11 = vadd.f32 %v476_v4, %v471_v8 }
 0x64b   : > { %v488_v12 = vpop.permute.xlu1 %487  ;;  %v486_v13 = vpop.permute.xlu0 %485 }
 0x64c   : > { %v492_v14 = vadd.f32 %v488_v12, %v482_v9  ;;  %v491_v15 = vadd.f32 %v486_v13, %v481_v11 }
 0x64e   : > { %v494_v16 = vadd.f32 %v492_v14, %v1859_v44  ;;  %v493_v17 = vadd.f32 %v491_v15, %v1857_v43 }
 0x650   : > { %v496_v18 = vmul.f32 0.2, %v494_v16  ;;  %v495_v19 = vmul.f32 0.2, %v493_v17 }
 0x652   : > { %v1367_v20 = vadd.f32 -0.5, %v496_v18  ;;  %v1366_v22 = vadd.f32 -0.5, %v495_v19 }
 0x654   : > { %v500_v23 = vmax.f32 %v1367_v20, 0.0  ;;  %v499_v24 = vmax.f32 %v1366_v22, 0.0 }
 0x656   : > { %v514_v25 = vsel %vm302_vm7, %v499_v24, inf  ;;  %v515_v26 = vsel %vm302_vm7, %v500_v23, inf  ;;  %v501_v27 = vsel %vm302_vm7, %v499_v24, -inf  ;;  %v502_v31 = vsel %vm302_vm7, %v500_v23, -inf }
 0x657   : > { %v516_v32 = vmin.f32 %v514_v25, %v515_v26  ;;  %v503_v33 = vmax.f32 %v501_v27, %v502_v31 }
 0x659   : > { %517 = vmin.xlane.f32.xlu1 %v516_v32  ;;  %504 = vmax.xlane.f32.xlu0 %v503_v33 }
 0x6e2   : > { %v518_v34 = vpop.xlane.xlu1 %517  ;;  %v505_v35 = vpop.xlane.xlu0 %504 }
 0x6e3   : > { %v519_v36 = vrot.slane %v518_v34, 4  ;;  %v506_v37 = vrot.slane %v505_v35, 4 }
 0x6e5   : > { %v520_v38 = vmin.f32 %v518_v34, %v519_v36  ;;  %v507_v39 = vmax.f32 %v505_v35, %v506_v37 }
 0x6e7   : > { %v521_v40 = vrot.slane %v520_v38, 2  ;;  %v508_v41 = vrot.slane %v507_v39, 2 }
 0x6e9   : > { %v509_v42 = vmax.f32 %v507_v39, %v508_v41  ;;  %v522_v45 = vmin.f32 %v520_v38, %v521_v40 }
 0x6eb   : > { %v510_v46 = vrot.slane %v509_v42, 1  ;;  %v523_v47 = vrot.slane %v522_v45, 1 }
 0x6ed   : > { %v511_v48 = vmax.f32 %v509_v42, %v510_v46  ;;  %v524_v49 = vmin.f32 %v522_v45, %v523_v47 }
 0x6ef   : > { %1394 = vpush %v511_v48 }
 0x6f0   : > { %1396 = vpush %v524_v49 }
 0x720   : > { %s1395_s21 = spop %1394 }
 0x721   : > { %v513_v50 = vstv %s1395_s21  ;;  %s1397_s28 = spop %1396 }
 0x722   : > { %v526_v51 = vstv %s1397_s28 }
 0x723   : > { %v527_v52 = vsub.f32 %v513_v50, %v526_v51  ;;  %v531_v54 = vsub.f32 %v499_v24, %v526_v51  ;;  %v532_v55 = vsub.f32 %v500_v23, %v526_v51 }
 0x725   : > { %vm528_vm10 = vcmp.gt.f32.partialorder %v527_v52, 0.0 }
 0x726   : > { %v529_v53 = vsel %vm528_vm10, %v527_v52, 1.0 }
 0x727   : > { %1484 = vrcp.f32 %v529_v53 }
 0x734   : > { %v1485_v56 = vpop.eup %1484 }
 0x735   : > { %v533_v57 = vmul.f32 %v1485_v56, %v531_v54  ;;  %v534_v58 = vmul.f32 %v1485_v56, %v532_v55 }
 0x737   : > { %v1903_v59 = vsel %vm528_vm10, %v533_v57, %v499_v24  ;;  %v1905_v60 = vsel %vm528_vm10, %v534_v58, %v500_v23 }
 0x738   : > { %558 = vrot.lane.b32.xlu1 %v1905_v60, %s1601_s18  ;;  %555 = vrot.lane.b32.xlu0 %v1903_v59, %s1601_s18  ;;  %v543_v12 = vrot.slane %v1903_v59, 7  ;;  %v544_v13 = vrot.slane %v1905_v60, 7  ;;  %v549_v14 = vrot.slane %v1903_v59, 1  ;;  %v550_v15 = vrot.slane %v1905_v60, 1 }
 0x73a   : > { %v552_v16 = vsel %vm242_vm6, %v550_v15, %v549_v14  ;;  %v546_v17 = vsel %vm235_vm5, %v544_v13, %v543_v12  ;;  %v545_v22 = vsel %vm235_vm5, %v543_v12, %v544_v13  ;;  %v551_v24 = vsel %vm242_vm6, %v549_v14, %v550_v15 }
 0x73b   : > { %v554_v18 = vmul.f32 %v1773_v10, %v552_v16  ;;  %v547_v19 = vmul.f32 %v1771_v5, %v546_v17 }
 0x73d   : > { %v572_v25 = vadd.f32 %v554_v18, %v545_v22  ;;  %v571_v26 = vadd.f32 %v551_v24, %v547_v19 }
 0x7aa   : > { %v559_v61 = vpop.permute.xlu1 %558  ;;  %v556_v62 = vpop.permute.xlu0 %555 }
 0x7ab   : > { %v560_v63 = vsel %vm247_vm4, %v559_v61, %v1905_v60  ;;  %v557_v0 = vsel %vm247_vm4, %v556_v62, %v1903_v59 }
 0x7ac   : > { %563 = vrot.lane.b32.xlu1 %v560_v63, %s1601_s18  ;;  %561 = vrot.lane.b32.xlu0 %v557_v0, %s1601_s18 }
 0x81e   : > { %v564_v2 = vpop.permute.xlu1 %563  ;;  %v562_v3 = vpop.permute.xlu0 %561 }
 0x81f   : > { %v566_v4 = vsel %vm247_vm4, %v564_v2, %v1905_v60  ;;  %v565_v6 = vsel %vm247_vm4, %v562_v3, %v1903_v59 }
 0x820   : > { %v568_v7 = vmul.f32 %v566_v4, %v1781_v21  ;;  %v567_v8 = vmul.f32 %v565_v6, %v1781_v21  ;;  %v570_v9 = vmul.f32 %v566_v4, %v1788_v28  ;;  %v569_v11 = vmul.f32 %v565_v6, %v1788_v28 }
 0x822   : > { %577 = vrot.lane.b32.xlu1 %v568_v7, %s1604_s29  ;;  %575 = vrot.lane.b32.xlu0 %v567_v8, %s1604_s29 }
 0x826   : > { %587 = vrot.lane.b32.xlu1 %v570_v9, %s1605_s30  ;;  %585 = vrot.lane.b32.xlu0 %v569_v11, %s1605_s30 }
 0x894   : > { %v578_v20 = vpop.permute.xlu1 %577  ;;  %v576_v23 = vpop.permute.xlu0 %575 }
 0x895   : > { %v582_v27 = vadd.f32 %v578_v20, %v572_v25  ;;  %v581_v31 = vadd.f32 %v576_v23, %v571_v26 }
 0x898   : > { %v588_v32 = vpop.permute.xlu1 %587  ;;  %v586_v33 = vpop.permute.xlu0 %585 }
 0x899   : > { %v592_v34 = vadd.f32 %v588_v32, %v582_v27  ;;  %v591_v35 = vadd.f32 %v586_v33, %v581_v31 }
 0x89b   : > { %v594_v36 = vadd.f32 %v592_v34, %v1905_v60  ;;  %v593_v37 = vadd.f32 %v591_v35, %v1903_v59 }
 0x89d   : > { %v596_v38 = vmul.f32 0.2, %v594_v36  ;;  %v595_v39 = vmul.f32 0.2, %v593_v37 }
 0x89f   : > { %v1369_v40 = vadd.f32 -0.5, %v596_v38  ;;  %v1368_v41 = vadd.f32 -0.5, %v595_v39 }
 0x8a1   : > { %v600_v42 = vmax.f32 %v1369_v40, 0.0  ;;  %v599_v45 = vmax.f32 %v1368_v41, 0.0 }
 0x8a3   : > { %v614_v46 = vsel %vm302_vm7, %v599_v45, inf  ;;  %v615_v47 = vsel %vm302_vm7, %v600_v42, inf  ;;  %v601_v48 = vsel %vm302_vm7, %v599_v45, -inf  ;;  %v602_v49 = vsel %vm302_vm7, %v600_v42, -inf }
 0x8a4   : > { %v616_v50 = vmin.f32 %v614_v46, %v615_v47  ;;  %v603_v51 = vmax.f32 %v601_v48, %v602_v49 }
 0x8a6   : > { %617 = vmin.xlane.f32.xlu1 %v616_v50  ;;  %604 = vmax.xlane.f32.xlu0 %v603_v51 }
 0x92f   : > { %v618_v52 = vpop.xlane.xlu1 %617  ;;  %v605_v53 = vpop.xlane.xlu0 %604 }
 0x930   : > { %v619_v54 = vrot.slane %v618_v52, 4  ;;  %v606_v55 = vrot.slane %v605_v53, 4 }
 0x932   : > { %v620_v56 = vmin.f32 %v618_v52, %v619_v54  ;;  %v607_v57 = vmax.f32 %v605_v53, %v606_v55 }
 0x934   : > { %v621_v58 = vrot.slane %v620_v56, 2  ;;  %v608_v61 = vrot.slane %v607_v57, 2 }
 0x936   : > { %v609_v62 = vmax.f32 %v607_v57, %v608_v61  ;;  %v622_v63 = vmin.f32 %v620_v56, %v621_v58 }
 0x938   : > { %v610_v0 = vrot.slane %v609_v62, 1  ;;  %v623_v2 = vrot.slane %v622_v63, 1 }
 0x93a   : > { %v611_v3 = vmax.f32 %v609_v62, %v610_v0  ;;  %v624_v4 = vmin.f32 %v622_v63, %v623_v2 }
 0x93c   : > { %1398 = vpush %v611_v3 }
 0x93d   : > { %1400 = vpush %v624_v4 }
 0x96d   : > { %s1399_s5 = spop %1398 }
 0x96e   : > { %v613_v6 = vstv %s1399_s5  ;;  %s1401_s6 = spop %1400 }
 0x96f   : > { %v626_v7 = vstv %s1401_s6 }
 0x970   : > { %v627_v8 = vsub.f32 %v613_v6, %v626_v7  ;;  %v631_v11 = vsub.f32 %v599_v45, %v626_v7  ;;  %v632_v12 = vsub.f32 %v600_v42, %v626_v7 }
 0x972   : > { %vm628_vm11 = vcmp.gt.f32.partialorder %v627_v8, 0.0 }
 0x973   : > { %v629_v9 = vsel %vm628_vm11, %v627_v8, 1.0 }
 0x974   : > { %1486 = vrcp.f32 %v629_v9 }
 0x981   : > { %v1487_v13 = vpop.eup %1486 }
 0x982   : > { %v633_v14 = vmul.f32 %v1487_v13, %v631_v11  ;;  %v634_v15 = vmul.f32 %v1487_v13, %v632_v12 }
 0x984   : > { %v1949_v16 = vsel %vm628_vm11, %v633_v14, %v599_v45  ;;  %v1951_v17 = vsel %vm628_vm11, %v634_v15, %v600_v42 }
 0x985   : > { %658 = vrot.lane.b32.xlu1 %v1951_v17, %s1601_s18  ;;  %655 = vrot.lane.b32.xlu0 %v1949_v16, %s1601_s18  ;;  %v643_v34 = vrot.slane %v1949_v16, 7  ;;  %v644_v35 = vrot.slane %v1951_v17, 7  ;;  %v649_v36 = vrot.slane %v1949_v16, 1  ;;  %v650_v37 = vrot.slane %v1951_v17, 1 }
 0x987   : > { %v652_v38 = vsel %vm242_vm6, %v650_v37, %v649_v36  ;;  %v646_v39 = vsel %vm235_vm5, %v644_v35, %v643_v34  ;;  %v645_v45 = vsel %vm235_vm5, %v643_v34, %v644_v35  ;;  %v651_v47 = vsel %vm242_vm6, %v649_v36, %v650_v37 }
 0x988   : > { %v654_v40 = vmul.f32 %v1773_v10, %v652_v38  ;;  %v647_v41 = vmul.f32 %v1771_v5, %v646_v39 }
 0x98a   : > { %v672_v48 = vadd.f32 %v654_v40, %v645_v45  ;;  %v671_v49 = vadd.f32 %v651_v47, %v647_v41 }
 0x9f7   : > { %v659_v18 = vpop.permute.xlu1 %658  ;;  %v656_v19 = vpop.permute.xlu0 %655 }
 0x9f8   : > { %v660_v20 = vsel %vm247_vm4, %v659_v18, %v1951_v17  ;;  %v657_v22 = vsel %vm247_vm4, %v656_v19, %v1949_v16 }
 0x9f9   : > { %663 = vrot.lane.b32.xlu1 %v660_v20, %s1601_s18  ;;  %661 = vrot.lane.b32.xlu0 %v657_v22, %s1601_s18 }
 0xa6b   : > { %v664_v23 = vpop.permute.xlu1 %663  ;;  %v662_v24 = vpop.permute.xlu0 %661 }
 0xa6c   : > { %v666_v25 = vsel %vm247_vm4, %v664_v23, %v1951_v17  ;;  %v665_v26 = vsel %vm247_vm4, %v662_v24, %v1949_v16 }
 0xa6d   : > { %v668_v27 = vmul.f32 %v666_v25, %v1781_v21  ;;  %v667_v31 = vmul.f32 %v665_v26, %v1781_v21  ;;  %v670_v32 = vmul.f32 %v666_v25, %v1788_v28  ;;  %v669_v33 = vmul.f32 %v665_v26, %v1788_v28 }
 0xa6f   : > { %677 = vrot.lane.b32.xlu1 %v668_v27, %s1604_s29  ;;  %675 = vrot.lane.b32.xlu0 %v667_v31, %s1604_s29 }
 0xa73   : > { %687 = vrot.lane.b32.xlu1 %v670_v32, %s1605_s30  ;;  %685 = vrot.lane.b32.xlu0 %v669_v33, %s1605_s30 }
 0xae1   : > { %v678_v42 = vpop.permute.xlu1 %677  ;;  %v676_v46 = vpop.permute.xlu0 %675 }
 0xae2   : > { %v682_v50 = vadd.f32 %v678_v42, %v672_v48  ;;  %v681_v51 = vadd.f32 %v676_v46, %v671_v49 }
 0xae5   : > { %v688_v52 = vpop.permute.xlu1 %687  ;;  %v686_v53 = vpop.permute.xlu0 %685 }
 0xae6   : > { %v692_v54 = vadd.f32 %v688_v52, %v682_v50  ;;  %v691_v55 = vadd.f32 %v686_v53, %v681_v51 }
 0xae8   : > { %v694_v56 = vadd.f32 %v692_v54, %v1951_v17  ;;  %v693_v57 = vadd.f32 %v691_v55, %v1949_v16 }
 0xaea   : > { %v696_v58 = vmul.f32 0.2, %v694_v56  ;;  %v695_v61 = vmul.f32 0.2, %v693_v57 }
 0xaec   : > { %v1371_v62 = vadd.f32 -0.5, %v696_v58  ;;  %v1370_v63 = vadd.f32 -0.5, %v695_v61 }
 0xaee   : > { %v700_v0 = vmax.f32 %v1371_v62, 0.0  ;;  %v699_v2 = vmax.f32 %v1370_v63, 0.0 }
 0xaf0   : > { %v714_v3 = vsel %vm302_vm7, %v699_v2, inf  ;;  %v715_v4 = vsel %vm302_vm7, %v700_v0, inf  ;;  %v701_v6 = vsel %vm302_vm7, %v699_v2, -inf  ;;  %v702_v7 = vsel %vm302_vm7, %v700_v0, -inf }
 0xaf1   : > { %v716_v8 = vmin.f32 %v714_v3, %v715_v4  ;;  %v703_v9 = vmax.f32 %v701_v6, %v702_v7 }
 0xaf3   : > { %717 = vmin.xlane.f32.xlu1 %v716_v8  ;;  %704 = vmax.xlane.f32.xlu0 %v703_v9 }
 0xb7c   : > { %v718_v11 = vpop.xlane.xlu1 %717  ;;  %v705_v12 = vpop.xlane.xlu0 %704 }
 0xb7d   : > { %v719_v13 = vrot.slane %v718_v11, 4  ;;  %v706_v14 = vrot.slane %v705_v12, 4 }
 0xb7f   : > { %v720_v15 = vmin.f32 %v718_v11, %v719_v13  ;;  %v707_v18 = vmax.f32 %v705_v12, %v706_v14 }
 0xb81   : > { %v721_v19 = vrot.slane %v720_v15, 2  ;;  %v708_v20 = vrot.slane %v707_v18, 2 }
 0xb83   : > { %v709_v22 = vmax.f32 %v707_v18, %v708_v20  ;;  %v722_v23 = vmin.f32 %v720_v15, %v721_v19 }
 0xb85   : > { %v710_v24 = vrot.slane %v709_v22, 1  ;;  %v723_v25 = vrot.slane %v722_v23, 1 }
 0xb87   : > { %v711_v26 = vmax.f32 %v709_v22, %v710_v24  ;;  %v724_v27 = vmin.f32 %v722_v23, %v723_v25 }
 0xb89   : > { %1402 = vpush %v711_v26 }
 0xb8a   : > { %1404 = vpush %v724_v27 }
 0xbba   : > { %s1403_s19 = spop %1402 }
 0xbbb   : > { %v713_v31 = vstv %s1403_s19  ;;  %s1405_s20 = spop %1404 }
 0xbbc   : > { %v726_v32 = vstv %s1405_s20 }
 0xbbd   : > { %v727_v33 = vsub.f32 %v713_v31, %v726_v32  ;;  %v731_v35 = vsub.f32 %v699_v2, %v726_v32  ;;  %v732_v36 = vsub.f32 %v700_v0, %v726_v32 }
 0xbbf   : > { %vm728_vm12 = vcmp.gt.f32.partialorder %v727_v33, 0.0 }
 0xbc0   : > { %v729_v34 = vsel %vm728_vm12, %v727_v33, 1.0 }
 0xbc1   : > { %1488 = vrcp.f32 %v729_v34 }
 0xbce   : > { %v1489_v37 = vpop.eup %1488 }
 0xbcf   : > { %v733_v38 = vmul.f32 %v1489_v37, %v731_v35  ;;  %v734_v39 = vmul.f32 %v1489_v37, %v732_v36 }
 0xbd1   : > { %v1995_v40 = vsel %vm728_vm12, %v733_v38, %v699_v2  ;;  %v1997_v41 = vsel %vm728_vm12, %v734_v39, %v700_v0 }
 0xbd2   : > { %758 = vrot.lane.b32.xlu1 %v1997_v41, %s1601_s18  ;;  %755 = vrot.lane.b32.xlu0 %v1995_v40, %s1601_s18  ;;  %v743_v56 = vrot.slane %v1995_v40, 7  ;;  %v744_v57 = vrot.slane %v1997_v41, 7  ;;  %v749_v58 = vrot.slane %v1995_v40, 1  ;;  %v750_v61 = vrot.slane %v1997_v41, 1 }
 0xbd4   : > { %v752_v62 = vsel %vm242_vm6, %v750_v61, %v749_v58  ;;  %v746_v63 = vsel %vm235_vm5, %v744_v57, %v743_v56  ;;  %v745_v4 = vsel %vm235_vm5, %v743_v56, %v744_v57  ;;  %v751_v7 = vsel %vm242_vm6, %v749_v58, %v750_v61 }
 0xbd5   : > { %v754_v0 = vmul.f32 %v1773_v10, %v752_v62  ;;  %v747_v2 = vmul.f32 %v1771_v5, %v746_v63 }
 0xbd7   : > { %v772_v8 = vadd.f32 %v754_v0, %v745_v4  ;;  %v771_v9 = vadd.f32 %v751_v7, %v747_v2 }
 0xc44   : > { %v759_v42 = vpop.permute.xlu1 %758  ;;  %v756_v45 = vpop.permute.xlu0 %755 }
 0xc45   : > { %v760_v46 = vsel %vm247_vm4, %v759_v42, %v1997_v41  ;;  %v757_v47 = vsel %vm247_vm4, %v756_v45, %v1995_v40 }
 0xc46   : > { %763 = vrot.lane.b32.xlu1 %v760_v46, %s1601_s18  ;;  %761 = vrot.lane.b32.xlu0 %v757_v47, %s1601_s18 }
 0xcb8   : > { %v764_v48 = vpop.permute.xlu1 %763  ;;  %v762_v49 = vpop.permute.xlu0 %761 }
 0xcb9   : > { %v766_v50 = vsel %vm247_vm4, %v764_v48, %v1997_v41  ;;  %v765_v51 = vsel %vm247_vm4, %v762_v49, %v1995_v40 }
 0xcba   : > { %v768_v52 = vmul.f32 %v766_v50, %v1781_v21  ;;  %v767_v53 = vmul.f32 %v765_v51, %v1781_v21  ;;  %v770_v54 = vmul.f32 %v766_v50, %v1788_v28  ;;  %v769_v55 = vmul.f32 %v765_v51, %v1788_v28 }
 0xcbc   : > { %777 = vrot.lane.b32.xlu1 %v768_v52, %s1604_s29  ;;  %775 = vrot.lane.b32.xlu0 %v767_v53, %s1604_s29 }
 0xcc0   : > { %787 = vrot.lane.b32.xlu1 %v770_v54, %s1605_s30  ;;  %785 = vrot.lane.b32.xlu0 %v769_v55, %s1605_s30 }
 0xd2e   : > { %v778_v3 = vpop.permute.xlu1 %777  ;;  %v776_v6 = vpop.permute.xlu0 %775 }
 0xd2f   : > { %v782_v11 = vadd.f32 %v778_v3, %v772_v8  ;;  %v781_v12 = vadd.f32 %v776_v6, %v771_v9 }
 0xd32   : > { %v788_v13 = vpop.permute.xlu1 %787  ;;  %v786_v14 = vpop.permute.xlu0 %785 }
 0xd33   : > { %v792_v15 = vadd.f32 %v788_v13, %v782_v11  ;;  %v791_v18 = vadd.f32 %v786_v14, %v781_v12 }
 0xd35   : > { %v794_v19 = vadd.f32 %v792_v15, %v1997_v41  ;;  %v793_v20 = vadd.f32 %v791_v18, %v1995_v40 }
 0xd37   : > { %v796_v22 = vmul.f32 0.2, %v794_v19  ;;  %v795_v23 = vmul.f32 0.2, %v793_v20 }
 0xd39   : > { %v1373_v24 = vadd.f32 -0.5, %v796_v22  ;;  %v1372_v25 = vadd.f32 -0.5, %v795_v23 }
 0xd3b   : > { %v800_v26 = vmax.f32 %v1373_v24, 0.0  ;;  %v799_v27 = vmax.f32 %v1372_v25, 0.0 }
 0xd3d   : > { %v814_v31 = vsel %vm302_vm7, %v799_v27, inf  ;;  %v815_v32 = vsel %vm302_vm7, %v800_v26, inf  ;;  %v801_v33 = vsel %vm302_vm7, %v799_v27, -inf  ;;  %v802_v34 = vsel %vm302_vm7, %v800_v26, -inf }
 0xd3e   : > { %v816_v35 = vmin.f32 %v814_v31, %v815_v32  ;;  %v803_v36 = vmax.f32 %v801_v33, %v802_v34 }
 0xd40   : > { %817 = vmin.xlane.f32.xlu1 %v816_v35  ;;  %804 = vmax.xlane.f32.xlu0 %v803_v36 }
 0xdc9   : > { %v818_v37 = vpop.xlane.xlu1 %817  ;;  %v805_v38 = vpop.xlane.xlu0 %804 }
 0xdca   : > { %v819_v39 = vrot.slane %v818_v37, 4  ;;  %v806_v42 = vrot.slane %v805_v38, 4 }
 0xdcc   : > { %v820_v45 = vmin.f32 %v818_v37, %v819_v39  ;;  %v807_v46 = vmax.f32 %v805_v38, %v806_v42 }
 0xdce   : > { %v821_v47 = vrot.slane %v820_v45, 2  ;;  %v808_v48 = vrot.slane %v807_v46, 2 }
 0xdd0   : > { %v809_v49 = vmax.f32 %v807_v46, %v808_v48  ;;  %v822_v50 = vmin.f32 %v820_v45, %v821_v47 }
 0xdd2   : > { %v810_v51 = vrot.slane %v809_v49, 1  ;;  %v823_v52 = vrot.slane %v822_v50, 1 }
 0xdd4   : > { %v811_v53 = vmax.f32 %v809_v49, %v810_v51  ;;  %v824_v54 = vmin.f32 %v822_v50, %v823_v52 }
 0xdd6   : > { %1406 = vpush %v811_v53 }
 0xdd7   : > { %1408 = vpush %v824_v54 }
 0xe07   : > { %s1407_s7 = spop %1406 }
 0xe08   : > { %v813_v55 = vstv %s1407_s7  ;;  %s1409_s8 = spop %1408 }
 0xe09   : > { %v826_v56 = vstv %s1409_s8 }
 0xe0a   : > { %v827_v57 = vsub.f32 %v813_v55, %v826_v56  ;;  %v831_v61 = vsub.f32 %v799_v27, %v826_v56  ;;  %v832_v62 = vsub.f32 %v800_v26, %v826_v56 }
 0xe0c   : > { %vm828_vm13 = vcmp.gt.f32.partialorder %v827_v57, 0.0 }
 0xe0d   : > { %v829_v58 = vsel %vm828_vm13, %v827_v57, 1.0 }
 0xe0e   : > { %1490 = vrcp.f32 %v829_v58 }
 0xe1b   : > { %v1491_v63 = vpop.eup %1490 }
 0xe1c   : > { %v833_v0 = vmul.f32 %v1491_v63, %v831_v61  ;;  %v834_v2 = vmul.f32 %v1491_v63, %v832_v62 }
 0xe1e   : > { %v2041_v3 = vsel %vm828_vm13, %v833_v0, %v799_v27  ;;  %v2043_v4 = vsel %vm828_vm13, %v834_v2, %v800_v26 }
 0xe1f   : > { %858 = vrot.lane.b32.xlu1 %v2043_v4, %s1601_s18  ;;  %855 = vrot.lane.b32.xlu0 %v2041_v3, %s1601_s18  ;;  %v843_v22 = vrot.slane %v2041_v3, 7  ;;  %v844_v23 = vrot.slane %v2043_v4, 7  ;;  %v849_v24 = vrot.slane %v2041_v3, 1  ;;  %v850_v25 = vrot.slane %v2043_v4, 1 }
 0xe21   : > { %v852_v26 = vsel %vm242_vm6, %v850_v25, %v849_v24  ;;  %v846_v27 = vsel %vm235_vm5, %v844_v23, %v843_v22  ;;  %v845_v34 = vsel %vm235_vm5, %v843_v22, %v844_v23  ;;  %v851_v36 = vsel %vm242_vm6, %v849_v24, %v850_v25 }
 0xe22   : > { %v854_v31 = vmul.f32 %v1773_v10, %v852_v26  ;;  %v847_v32 = vmul.f32 %v1771_v5, %v846_v27 }
 0xe24   : > { %v872_v37 = vadd.f32 %v854_v31, %v845_v34  ;;  %v871_v38 = vadd.f32 %v851_v36, %v847_v32 }
 0xe91   : > { %v859_v6 = vpop.permute.xlu1 %858  ;;  %v856_v7 = vpop.permute.xlu0 %855 }
 0xe92   : > { %v860_v8 = vsel %vm247_vm4, %v859_v6, %v2043_v4  ;;  %v857_v9 = vsel %vm247_vm4, %v856_v7, %v2041_v3 }
 0xe93   : > { %863 = vrot.lane.b32.xlu1 %v860_v8, %s1601_s18  ;;  %861 = vrot.lane.b32.xlu0 %v857_v9, %s1601_s18 }
 0xf05   : > { %v864_v11 = vpop.permute.xlu1 %863  ;;  %v862_v12 = vpop.permute.xlu0 %861 }
 0xf06   : > { %v866_v13 = vsel %vm247_vm4, %v864_v11, %v2043_v4  ;;  %v865_v14 = vsel %vm247_vm4, %v862_v12, %v2041_v3 }
 0xf07   : > { %v868_v15 = vmul.f32 %v866_v13, %v1781_v21  ;;  %v867_v18 = vmul.f32 %v865_v14, %v1781_v21  ;;  %v870_v19 = vmul.f32 %v866_v13, %v1788_v28  ;;  %v869_v20 = vmul.f32 %v865_v14, %v1788_v28 }
 0xf09   : > { %877 = vrot.lane.b32.xlu1 %v868_v15, %s1604_s29  ;;  %875 = vrot.lane.b32.xlu0 %v867_v18, %s1604_s29 }
 0xf0d   : > { %887 = vrot.lane.b32.xlu1 %v870_v19, %s1605_s30  ;;  %885 = vrot.lane.b32.xlu0 %v869_v20, %s1605_s30 }
 0xf7b   : > { %v878_v33 = vpop.permute.xlu1 %877  ;;  %v876_v35 = vpop.permute.xlu0 %875 }
 0xf7c   : > { %v882_v39 = vadd.f32 %v878_v33, %v872_v37  ;;  %v881_v42 = vadd.f32 %v876_v35, %v871_v38 }
 0xf7f   : > { %v888_v45 = vpop.permute.xlu1 %887  ;;  %v886_v46 = vpop.permute.xlu0 %885 }
 0xf80   : > { %v892_v47 = vadd.f32 %v888_v45, %v882_v39  ;;  %v891_v48 = vadd.f32 %v886_v46, %v881_v42 }
 0xf82   : > { %v894_v49 = vadd.f32 %v892_v47, %v2043_v4  ;;  %v893_v50 = vadd.f32 %v891_v48, %v2041_v3 }
 0xf84   : > { %v896_v51 = vmul.f32 0.2, %v894_v49  ;;  %v895_v52 = vmul.f32 0.2, %v893_v50 }
 0xf86   : > { %v1375_v53 = vadd.f32 -0.5, %v896_v51  ;;  %v1374_v54 = vadd.f32 -0.5, %v895_v52 }
 0xf88   : > { %v900_v55 = vmax.f32 %v1375_v53, 0.0  ;;  %v899_v56 = vmax.f32 %v1374_v54, 0.0 }
 0xf8a   : > { %v914_v57 = vsel %vm302_vm7, %v899_v56, inf  ;;  %v915_v58 = vsel %vm302_vm7, %v900_v55, inf  ;;  %v901_v61 = vsel %vm302_vm7, %v899_v56, -inf  ;;  %v902_v62 = vsel %vm302_vm7, %v900_v55, -inf }
 0xf8b   : > { %v916_v63 = vmin.f32 %v914_v57, %v915_v58  ;;  %v903_v0 = vmax.f32 %v901_v61, %v902_v62 }
 0xf8d   : > { %917 = vmin.xlane.f32.xlu1 %v916_v63  ;;  %904 = vmax.xlane.f32.xlu0 %v903_v0 }
0x1016   : > { %v918_v2 = vpop.xlane.xlu1 %917  ;;  %v905_v6 = vpop.xlane.xlu0 %904 }
0x1017   : > { %v919_v7 = vrot.slane %v918_v2, 4  ;;  %v906_v8 = vrot.slane %v905_v6, 4 }
0x1019   : > { %v920_v9 = vmin.f32 %v918_v2, %v919_v7  ;;  %v907_v11 = vmax.f32 %v905_v6, %v906_v8 }
0x101b   : > { %v921_v12 = vrot.slane %v920_v9, 2  ;;  %v908_v13 = vrot.slane %v907_v11, 2 }
0x101d   : > { %v909_v14 = vmax.f32 %v907_v11, %v908_v13  ;;  %v922_v15 = vmin.f32 %v920_v9, %v921_v12 }
0x101f   : > { %v910_v18 = vrot.slane %v909_v14, 1  ;;  %v923_v19 = vrot.slane %v922_v15, 1 }
0x1021   : > { %v911_v20 = vmax.f32 %v909_v14, %v910_v18  ;;  %v924_v22 = vmin.f32 %v922_v15, %v923_v19 }
0x1023   : > { %1410 = vpush %v911_v20 }
0x1024   : > { %1412 = vpush %v924_v22 }
0x1054   : > { %s1411_s9 = spop %1410 }
0x1055   : > { %v913_v23 = vstv %s1411_s9  ;;  %s1413_s15 = spop %1412 }
0x1056   : > { %v926_v24 = vstv %s1413_s15 }
0x1057   : > { %v927_v25 = vsub.f32 %v913_v23, %v926_v24  ;;  %v931_v27 = vsub.f32 %v899_v56, %v926_v24  ;;  %v932_v31 = vsub.f32 %v900_v55, %v926_v24 }
0x1059   : > { %vm928_vm14 = vcmp.gt.f32.partialorder %v927_v25, 0.0 }
0x105a   : > { %v929_v26 = vsel %vm928_vm14, %v927_v25, 1.0 }
0x105b   : > { %1492 = vrcp.f32 %v929_v26 }
0x1068   : > { %v1493_v32 = vpop.eup %1492 }
0x1069   : > { %v933_v33 = vmul.f32 %v1493_v32, %v931_v27  ;;  %v934_v34 = vmul.f32 %v1493_v32, %v932_v31 }
0x106b   : > { %v2087_v35 = vsel %vm928_vm14, %v933_v33, %v899_v56  ;;  %v2089_v36 = vsel %vm928_vm14, %v934_v34, %v900_v55 }
0x106c   : > { %958 = vrot.lane.b32.xlu1 %v2089_v36, %s1601_s18  ;;  %955 = vrot.lane.b32.xlu0 %v2087_v35, %s1601_s18  ;;  %v943_v53 = vrot.slane %v2087_v35, 7  ;;  %v944_v54 = vrot.slane %v2089_v36, 7  ;;  %v949_v55 = vrot.slane %v2087_v35, 1  ;;  %v950_v56 = vrot.slane %v2089_v36, 1 }
0x106e   : > { %v952_v57 = vsel %vm242_vm6, %v950_v56, %v949_v55  ;;  %v946_v58 = vsel %vm235_vm5, %v944_v54, %v943_v53  ;;  %v945_v0 = vsel %vm235_vm5, %v943_v53, %v944_v54  ;;  %v951_v6 = vsel %vm242_vm6, %v949_v55, %v950_v56 }
0x106f   : > { %v954_v61 = vmul.f32 %v1773_v10, %v952_v57  ;;  %v947_v62 = vmul.f32 %v1771_v5, %v946_v58 }
0x1071   : > { %v972_v7 = vadd.f32 %v954_v61, %v945_v0  ;;  %v971_v8 = vadd.f32 %v951_v6, %v947_v62 }
0x10de   : > { %v959_v37 = vpop.permute.xlu1 %958  ;;  %v956_v38 = vpop.permute.xlu0 %955 }
0x10df   : > { %v960_v39 = vsel %vm247_vm4, %v959_v37, %v2089_v36  ;;  %v957_v42 = vsel %vm247_vm4, %v956_v38, %v2087_v35 }
0x10e0   : > { %963 = vrot.lane.b32.xlu1 %v960_v39, %s1601_s18  ;;  %961 = vrot.lane.b32.xlu0 %v957_v42, %s1601_s18 }
0x1152   : > { %v964_v45 = vpop.permute.xlu1 %963  ;;  %v962_v46 = vpop.permute.xlu0 %961 }
0x1153   : > { %v966_v47 = vsel %vm247_vm4, %v964_v45, %v2089_v36  ;;  %v965_v48 = vsel %vm247_vm4, %v962_v46, %v2087_v35 }
0x1154   : > { %v968_v49 = vmul.f32 %v966_v47, %v1781_v21  ;;  %v967_v50 = vmul.f32 %v965_v48, %v1781_v21  ;;  %v970_v51 = vmul.f32 %v966_v47, %v1788_v28  ;;  %v969_v52 = vmul.f32 %v965_v48, %v1788_v28 }
0x1156   : > { %977 = vrot.lane.b32.xlu1 %v968_v49, %s1604_s29  ;;  %975 = vrot.lane.b32.xlu0 %v967_v50, %s1604_s29 }
0x115a   : > { %987 = vrot.lane.b32.xlu1 %v970_v51, %s1605_s30  ;;  %985 = vrot.lane.b32.xlu0 %v969_v52, %s1605_s30 }
0x11c8   : > { %v978_v63 = vpop.permute.xlu1 %977  ;;  %v976_v2 = vpop.permute.xlu0 %975 }
0x11c9   : > { %v982_v9 = vadd.f32 %v978_v63, %v972_v7  ;;  %v981_v11 = vadd.f32 %v976_v2, %v971_v8 }
0x11cc   : > { %v988_v12 = vpop.permute.xlu1 %987  ;;  %v986_v13 = vpop.permute.xlu0 %985 }
0x11cd   : > { %v992_v14 = vadd.f32 %v988_v12, %v982_v9  ;;  %v991_v15 = vadd.f32 %v986_v13, %v981_v11 }
0x11cf   : > { %v994_v18 = vadd.f32 %v992_v14, %v2089_v36  ;;  %v993_v19 = vadd.f32 %v991_v15, %v2087_v35 }
0x11d1   : > { %v996_v20 = vmul.f32 0.2, %v994_v18  ;;  %v995_v22 = vmul.f32 0.2, %v993_v19 }
0x11d3   : > { %v1377_v23 = vadd.f32 -0.5, %v996_v20  ;;  %v1376_v24 = vadd.f32 -0.5, %v995_v22 }
0x11d5   : > { %v1000_v25 = vmax.f32 %v1377_v23, 0.0  ;;  %v999_v26 = vmax.f32 %v1376_v24, 0.0 }
0x11d7   : > { %v1014_v27 = vsel %vm302_vm7, %v999_v26, inf  ;;  %v1015_v31 = vsel %vm302_vm7, %v1000_v25, inf  ;;  %v1001_v32 = vsel %vm302_vm7, %v999_v26, -inf  ;;  %v1002_v33 = vsel %vm302_vm7, %v1000_v25, -inf }
0x11d8   : > { %v1016_v34 = vmin.f32 %v1014_v27, %v1015_v31  ;;  %v1003_v37 = vmax.f32 %v1001_v32, %v1002_v33 }
0x11da   : > { %1017 = vmin.xlane.f32.xlu1 %v1016_v34  ;;  %1004 = vmax.xlane.f32.xlu0 %v1003_v37 }
0x1263   : > { %v1018_v38 = vpop.xlane.xlu1 %1017  ;;  %v1005_v39 = vpop.xlane.xlu0 %1004 }
0x1264   : > { %v1019_v42 = vrot.slane %v1018_v38, 4  ;;  %v1006_v45 = vrot.slane %v1005_v39, 4 }
0x1266   : > { %v1020_v46 = vmin.f32 %v1018_v38, %v1019_v42  ;;  %v1007_v47 = vmax.f32 %v1005_v39, %v1006_v45 }
0x1268   : > { %v1021_v48 = vrot.slane %v1020_v46, 2  ;;  %v1008_v49 = vrot.slane %v1007_v47, 2 }
0x126a   : > { %v1009_v50 = vmax.f32 %v1007_v47, %v1008_v49  ;;  %v1022_v51 = vmin.f32 %v1020_v46, %v1021_v48 }
0x126c   : > { %v1010_v52 = vrot.slane %v1009_v50, 1  ;;  %v1023_v53 = vrot.slane %v1022_v51, 1 }
0x126e   : > { %v1011_v54 = vmax.f32 %v1009_v50, %v1010_v52  ;;  %v1024_v55 = vmin.f32 %v1022_v51, %v1023_v53 }
0x1270   : > { %1414 = vpush %v1011_v54 }
0x1271   : > { %1416 = vpush %v1024_v55 }
0x12a1   : > { %s1415_s23 = spop %1414 }
0x12a2   : > { %v1013_v56 = vstv %s1415_s23  ;;  %s1417_s25 = spop %1416 }
0x12a3   : > { %v1026_v57 = vstv %s1417_s25 }
0x12a4   : > { %v1027_v58 = vsub.f32 %v1013_v56, %v1026_v57  ;;  %v1031_v62 = vsub.f32 %v999_v26, %v1026_v57  ;;  %v1032_v63 = vsub.f32 %v1000_v25, %v1026_v57 }
0x12a6   : > { %vm1028_vm15 = vcmp.gt.f32.partialorder %v1027_v58, 0.0 }
0x12a7   : > { %v1029_v61 = vsel %vm1028_vm15, %v1027_v58, 1.0 }
0x12a8   : > { %1494 = vrcp.f32 %v1029_v61 }
0x12b5   : > { %v1495_v0 = vpop.eup %1494 }
0x12b6   : > { %v1033_v2 = vmul.f32 %v1495_v0, %v1031_v62  ;;  %v1034_v6 = vmul.f32 %v1495_v0, %v1032_v63 }
0x12b8   : > { %v2133_v7 = vsel %vm1028_vm15, %v1033_v2, %v999_v26  ;;  %v2135_v8 = vsel %vm1028_vm15, %v1034_v6, %v1000_v25 }
0x12b9   : > { %1058 = vrot.lane.b32.xlu1 %v2135_v8, %s1601_s18  ;;  %1055 = vrot.lane.b32.xlu0 %v2133_v7, %s1601_s18  ;;  %v1043_v25 = vrot.slane %v2133_v7, 7  ;;  %v1044_v26 = vrot.slane %v2135_v8, 7  ;;  %v1049_v27 = vrot.slane %v2133_v7, 1  ;;  %v1050_v31 = vrot.slane %v2135_v8, 1 }
0x12bb   : > { %v1052_v32 = vsel %vm242_vm6, %v1050_v31, %v1049_v27  ;;  %v1046_v33 = vsel %vm235_vm5, %v1044_v26, %v1043_v25  ;;  %v1045_v39 = vsel %vm235_vm5, %v1043_v25, %v1044_v26  ;;  %v1051_v45 = vsel %vm242_vm6, %v1049_v27, %v1050_v31 }
0x12bc   : > { %v1054_v34 = vmul.f32 %v1773_v10, %v1052_v32  ;;  %v1047_v37 = vmul.f32 %v1771_v5, %v1046_v33 }
0x12be   : > { %v1072_v46 = vadd.f32 %v1054_v34, %v1045_v39  ;;  %v1071_v47 = vadd.f32 %v1051_v45, %v1047_v37 }
0x132b   : > { %v1059_v9 = vpop.permute.xlu1 %1058  ;;  %v1056_v11 = vpop.permute.xlu0 %1055 }
0x132c   : > { %v1060_v12 = vsel %vm247_vm4, %v1059_v9, %v2135_v8  ;;  %v1057_v13 = vsel %vm247_vm4, %v1056_v11, %v2133_v7 }
0x132d   : > { %1063 = vrot.lane.b32.xlu1 %v1060_v12, %s1601_s18  ;;  %1061 = vrot.lane.b32.xlu0 %v1057_v13, %s1601_s18 }
0x139f   : > { %v1064_v14 = vpop.permute.xlu1 %1063  ;;  %v1062_v15 = vpop.permute.xlu0 %1061 }
0x13a0   : > { %v1066_v18 = vsel %vm247_vm4, %v1064_v14, %v2135_v8  ;;  %v1065_v19 = vsel %vm247_vm4, %v1062_v15, %v2133_v7 }
0x13a1   : > { %v1068_v20 = vmul.f32 %v1066_v18, %v1781_v21  ;;  %v1067_v22 = vmul.f32 %v1065_v19, %v1781_v21  ;;  %v1070_v23 = vmul.f32 %v1066_v18, %v1788_v28  ;;  %v1069_v24 = vmul.f32 %v1065_v19, %v1788_v28 }
0x13a3   : > { %1077 = vrot.lane.b32.xlu1 %v1068_v20, %s1604_s29  ;;  %1075 = vrot.lane.b32.xlu0 %v1067_v22, %s1604_s29 }
0x13a7   : > { %1087 = vrot.lane.b32.xlu1 %v1070_v23, %s1605_s30  ;;  %1085 = vrot.lane.b32.xlu0 %v1069_v24, %s1605_s30 }
0x1415   : > { %v1078_v38 = vpop.permute.xlu1 %1077  ;;  %v1076_v42 = vpop.permute.xlu0 %1075 }
0x1416   : > { %v1082_v48 = vadd.f32 %v1078_v38, %v1072_v46  ;;  %v1081_v49 = vadd.f32 %v1076_v42, %v1071_v47 }
0x1419   : > { %v1088_v50 = vpop.permute.xlu1 %1087  ;;  %v1086_v51 = vpop.permute.xlu0 %1085 }
0x141a   : > { %v1092_v52 = vadd.f32 %v1088_v50, %v1082_v48  ;;  %v1091_v53 = vadd.f32 %v1086_v51, %v1081_v49 }
0x141c   : > { %v1094_v54 = vadd.f32 %v1092_v52, %v2135_v8  ;;  %v1093_v55 = vadd.f32 %v1091_v53, %v2133_v7 }
0x141e   : > { %v1096_v56 = vmul.f32 0.2, %v1094_v54  ;;  %v1095_v57 = vmul.f32 0.2, %v1093_v55 }
0x1420   : > { %v1379_v58 = vadd.f32 -0.5, %v1096_v56  ;;  %v1378_v61 = vadd.f32 -0.5, %v1095_v57 }
0x1422   : > { %v1100_v62 = vmax.f32 %v1379_v58, 0.0  ;;  %v1099_v63 = vmax.f32 %v1378_v61, 0.0 }
0x1424   : > { %v1114_v0 = vsel %vm302_vm7, %v1099_v63, inf  ;;  %v1115_v2 = vsel %vm302_vm7, %v1100_v62, inf  ;;  %v1101_v6 = vsel %vm302_vm7, %v1099_v63, -inf  ;;  %v1102_v9 = vsel %vm302_vm7, %v1100_v62, -inf }
0x1425   : > { %v1116_v11 = vmin.f32 %v1114_v0, %v1115_v2  ;;  %v1103_v12 = vmax.f32 %v1101_v6, %v1102_v9 }
0x1427   : > { %1117 = vmin.xlane.f32.xlu1 %v1116_v11  ;;  %1104 = vmax.xlane.f32.xlu0 %v1103_v12 }
0x14b0   : > { %v1118_v13 = vpop.xlane.xlu1 %1117  ;;  %v1105_v14 = vpop.xlane.xlu0 %1104 }
0x14b1   : > { %v1119_v15 = vrot.slane %v1118_v13, 4  ;;  %v1106_v18 = vrot.slane %v1105_v14, 4 }
0x14b3   : > { %v1120_v19 = vmin.f32 %v1118_v13, %v1119_v15  ;;  %v1107_v20 = vmax.f32 %v1105_v14, %v1106_v18 }
0x14b5   : > { %v1121_v22 = vrot.slane %v1120_v19, 2  ;;  %v1108_v23 = vrot.slane %v1107_v20, 2 }
0x14b7   : > { %v1109_v24 = vmax.f32 %v1107_v20, %v1108_v23  ;;  %v1122_v25 = vmin.f32 %v1120_v19, %v1121_v22 }
0x14b9   : > { %v1110_v26 = vrot.slane %v1109_v24, 1  ;;  %v1123_v27 = vrot.slane %v1122_v25, 1 }
0x14bb   : > { %v1111_v31 = vmax.f32 %v1109_v24, %v1110_v26  ;;  %v1124_v32 = vmin.f32 %v1122_v25, %v1123_v27 }
0x14bd   : > { %1418 = vpush %v1111_v31 }
0x14be   : > { %1420 = vpush %v1124_v32 }
0x14ee   : > { %s1419_s27 = spop %1418 }
0x14ef   : > { %v1113_v33 = vstv %s1419_s27  ;;  %s1421_s3 = spop %1420 }
0x14f0   : > { %v1126_v34 = vstv %s1421_s3 }
0x14f1   : > { %v1127_v37 = vsub.f32 %v1113_v33, %v1126_v34  ;;  %v1131_v39 = vsub.f32 %v1099_v63, %v1126_v34  ;;  %v1132_v42 = vsub.f32 %v1100_v62, %v1126_v34 }
0x14f3   : > { %vm1128_vm0 = vcmp.gt.f32.partialorder %v1127_v37, 0.0 }
0x14f4   : > { %v1129_v38 = vsel %vm1128_vm0, %v1127_v37, 1.0 }
0x14f5   : > { %1496 = vrcp.f32 %v1129_v38 }
0x1502   : > { %v1497_v45 = vpop.eup %1496 }
0x1503   : > { %v1133_v46 = vmul.f32 %v1497_v45, %v1131_v39  ;;  %v1134_v47 = vmul.f32 %v1497_v45, %v1132_v42 }
0x1505   : > { %v2179_v48 = vsel %vm1128_vm0, %v1133_v46, %v1099_v63  ;;  %v2181_v49 = vsel %vm1128_vm0, %v1134_v47, %v1100_v62 }
0x1506   : > { %1158 = vrot.lane.b32.xlu1 %v2181_v49, %s1601_s18  ;;  %1155 = vrot.lane.b32.xlu0 %v2179_v48, %s1601_s18  ;;  %v1143_v0 = vrot.slane %v2179_v48, 7  ;;  %v1144_v2 = vrot.slane %v2181_v49, 7  ;;  %v1149_v6 = vrot.slane %v2179_v48, 1 }
0x1508   : > { %v1146_v11 = vsel %vm235_vm5, %v1144_v2, %v1143_v0  ;;  %v1145_v14 = vsel %vm235_vm5, %v1143_v0, %v1144_v2 }
0x1509   : > { %v1147_v12 = vmul.f32 %v1771_v5, %v1146_v11  ;;  %v439_v11 = vmul.f32 4.0, %v1857_v43  ;;  %v739_v43 = vmul.f32 25.0, %v1995_v40  ;;  %v1040_v40 = vmul.f32 64.0, %v2135_v8 }
0x1578   : > { %v1159_v50 = vpop.permute.xlu1 %1158  ;;  %v1156_v51 = vpop.permute.xlu0 %1155 }
0x1579   : > { %v1160_v52 = vsel %vm247_vm4, %v1159_v50, %v2181_v49  ;;  %v1157_v53 = vsel %vm247_vm4, %v1156_v51, %v2179_v48 }
0x157a   : > { %1163 = vrot.lane.b32.xlu1 %v1160_v52, %s1601_s18  ;;  %1161 = vrot.lane.b32.xlu0 %v1157_v53, %s1601_s18 }
0x15ec   : > { %v1164_v54 = vpop.permute.xlu1 %1163  ;;  %v1162_v55 = vpop.permute.xlu0 %1161 }
0x15ed   : > { %v1166_v56 = vsel %vm247_vm4, %v1164_v54, %v2181_v49  ;;  %v1165_v57 = vsel %vm247_vm4, %v1162_v55, %v2179_v48 }
0x15ee   : > { %v1168_v58 = vmul.f32 %v1166_v56, %v1781_v21  ;;  %v1167_v61 = vmul.f32 %v1165_v57, %v1781_v21  ;;  %v1170_v62 = vmul.f32 %v1166_v56, %v1788_v28  ;;  %v1169_v63 = vmul.f32 %v1165_v57, %v1788_v28 }
0x15ef   : > { %v1150_v21 = vrot.slane %v2181_v49, 1 }
0x15f0   : > { %1177 = vrot.lane.b32.xlu1 %v1168_v58, %s1604_s29  ;;  %1175 = vrot.lane.b32.xlu0 %v1167_v61, %s1604_s29 }
0x15f1   : > { %v1152_v9 = vsel %vm242_vm6, %v1150_v21, %v1149_v6  ;;  %v1151_v18 = vsel %vm242_vm6, %v1149_v6, %v1150_v21 }
0x15f2   : > { %v1154_v28 = vmul.f32 %v1773_v10, %v1152_v9  ;;  %v1171_v20 = vadd.f32 %v1151_v18, %v1147_v12 }
0x15f4   : > { %1187 = vrot.lane.b32.xlu1 %v1170_v62, %s1605_s30  ;;  %1185 = vrot.lane.b32.xlu0 %v1169_v63, %s1605_s30  ;;  %v1172_v19 = vadd.f32 %v1154_v28, %v1145_v14  ;;  %v440_v28 = vmul.f32 4.0, %v1859_v44  ;;  %v540_v14 = vmul.f32 9.0, %v1905_v60  ;;  %v740_v44 = vmul.f32 25.0, %v1997_v41 }
0x15f5   : > { %v840_v60 = vmul.f32 36.0, %v2043_v4  ;;  %v1139_v4 = vmul.f32 81.0, %v2179_v48 }
0x15f6   : > { %v442_v18 = vadd.f32 %v440_v28, %v1813_v30  ;;  %v939_v30 = vmul.f32 49.0, %v2087_v35 }
0x1662   : > { %v1178_v13 = vpop.permute.xlu1 %1177  ;;  %v1176_v15 = vpop.permute.xlu0 %1175 }
0x1663   : > { %v1182_v22 = vadd.f32 %v1178_v13, %v1172_v19  ;;  %v1181_v23 = vadd.f32 %v1176_v15, %v1171_v20  ;;  %v539_v13 = vmul.f32 9.0, %v1903_v59  ;;  %v441_v15 = vadd.f32 %v439_v11, %v1811_v29 }
0x1664   : > { %v639_v19 = vmul.f32 16.0, %v1949_v16  ;;  %v640_v20 = vmul.f32 16.0, %v1951_v17  ;;  %v839_v59 = vmul.f32 36.0, %v2041_v3  ;;  %v940_v16 = vmul.f32 49.0, %v2089_v36 }
0x1666   : > { %v1188_v24 = vpop.permute.xlu1 %1187  ;;  %v1186_v25 = vpop.permute.xlu0 %1185 }
0x1667   : > { %v1192_v26 = vadd.f32 %v1188_v24, %v1182_v22  ;;  %v1191_v27 = vadd.f32 %v1186_v25, %v1181_v23  ;;  %v541_v22 = vadd.f32 %v539_v13, %v441_v15  ;;  %v542_v23 = vadd.f32 %v540_v14, %v442_v18 }
0x1669   : > { %v1194_v10 = vadd.f32 %v1192_v26, %v2181_v49  ;;  %v1193_v5 = vadd.f32 %v1191_v27, %v2179_v48  ;;  %v641_v24 = vadd.f32 %v639_v19, %v541_v22  ;;  %v642_v25 = vadd.f32 %v640_v20, %v542_v23 }
0x166b   : > { %v1196_v31 = vmul.f32 0.2, %v1194_v10  ;;  %v1195_v32 = vmul.f32 0.2, %v1193_v5  ;;  %v741_v26 = vadd.f32 %v739_v43, %v641_v24  ;;  %v742_v29 = vadd.f32 %v740_v44, %v642_v25 }
0x166c   : > { %v1039_v10 = vmul.f32 64.0, %v2133_v7 }
0x166d   : > { %v1381_v33 = vadd.f32 -0.5, %v1196_v31  ;;  %v1380_v34 = vadd.f32 -0.5, %v1195_v32  ;;  %v841_v27 = vadd.f32 %v839_v59, %v741_v26  ;;  %v842_v17 = vadd.f32 %v840_v60, %v742_v29 }
0x166f   : > { %v2221_v37 = vmax.f32 %v1381_v33, 0.0  ;;  %v2223_v1 = vmax.f32 %v1380_v34, 0.0  ;;  %v941_v3 = vadd.f32 %v939_v30, %v841_v27  ;;  %v942_v32 = vadd.f32 %v940_v16, %v842_v17 }
0x1670   : > { %v1140_v33 = vmul.f32 81.0, %v2181_v49 }
0x1671   : > { %v1214_v38 = vsel %vm302_vm7, %v2223_v1, inf  ;;  %v1215_v39 = vsel %vm302_vm7, %v2221_v37, inf  ;;  %v1201_v42 = vsel %vm302_vm7, %v2223_v1, -inf  ;;  %v1202_v45 = vsel %vm302_vm7, %v2221_v37, -inf }
0x1672   : > { %v1216_v46 = vmin.f32 %v1214_v38, %v1215_v39  ;;  %v1203_v47 = vmax.f32 %v1201_v42, %v1202_v45  ;;  %v1041_v36 = vadd.f32 %v1039_v10, %v941_v3  ;;  %v1042_v38 = vadd.f32 %v1040_v40, %v942_v32 }
0x1674   : > { %1217 = vmin.xlane.f32.xlu1 %v1216_v46  ;;  %1204 = vmax.xlane.f32.xlu0 %v1203_v47  ;;  %v1141_v45 = vadd.f32 %v1139_v4, %v1041_v36  ;;  %v1142_v46 = vadd.f32 %v1140_v33, %v1042_v38 }
0x16fd   : > { %v1218_v50 = vpop.xlane.xlu1 %1217  ;;  %v1205_v51 = vpop.xlane.xlu0 %1204 }
0x16fe   : > { %v1219_v52 = vrot.slane %v1218_v50, 4  ;;  %v1206_v53 = vrot.slane %v1205_v51, 4 }
0x1700   : > { %v1220_v54 = vmin.f32 %v1218_v50, %v1219_v52  ;;  %v1207_v55 = vmax.f32 %v1205_v51, %v1206_v53 }
0x1702   : > { %v1221_v56 = vrot.slane %v1220_v54, 2  ;;  %v1208_v57 = vrot.slane %v1207_v55, 2 }
0x1704   : > { %v1222_v58 = vmin.f32 %v1220_v54, %v1221_v56  ;;  %v1209_v61 = vmax.f32 %v1207_v55, %v1208_v57 }
0x1706   : > { %v1210_v62 = vrot.slane %v1209_v61, 1  ;;  %v1223_v63 = vrot.slane %v1222_v58, 1 }
0x1708   : > { %v1211_v0 = vmax.f32 %v1209_v61, %v1210_v62  ;;  %v1224_v2 = vmin.f32 %v1222_v58, %v1223_v63 }
0x170a   : > { %1422 = vpush %v1211_v0 }
0x170b   : > { %1424 = vpush %v1224_v2 }
0x173b   : > { %s1423_s18 = spop %1422 }
0x173c   : > { %v1213_v6 = vstv %s1423_s18  ;;  %s1425_s16 = spop %1424 }
0x173d   : > { %v1226_v21 = vstv %s1425_s16 }
0x173e   : > { %v1227_v9 = vsub.f32 %v1213_v6, %v1226_v21  ;;  %v1231_v41 = vsub.f32 %v2223_v1, %v1226_v21  ;;  %v1232_v5 = vsub.f32 %v2221_v37, %v1226_v21 }
0x1740   : > { %vm1228_vm1 = vcmp.gt.f32.partialorder %v1227_v9, 0.0 }
0x1741   : > { %v1229_v12 = vsel %vm1228_vm1, %v1227_v9, 1.0 }
0x1742   : > { %1498 = vrcp.f32 %v1229_v12 }
0x174f   : > { %v1499_v31 = vpop.eup %1498 }
0x1750   : > { %v1233_v35 = vmul.f32 %v1499_v31, %v1231_v41  ;;  %v1234_v34 = vmul.f32 %v1499_v31, %v1232_v5 }
0x1752   : > { %v1237_v7 = vsel %vm1228_vm1, %v1233_v35, %v2223_v1  ;;  %v1238_v8 = vsel %vm1228_vm1, %v1234_v34, %v2221_v37 }
0x1753   : > { %v1239_v39 = vmul.f32 100.0, %v1237_v7  ;;  %v1240_v42 = vmul.f32 100.0, %v1238_v8 }
0x1755   : > { %v1241_v47 = vadd.f32 %v1239_v39, %v1141_v45  ;;  %v1242_v48 = vadd.f32 %v1240_v42, %v1142_v46 }
0x1757   : > { %v1243_v49 = vsel %vm302_vm7, %v1241_v47, 0.0  ;;  %v1244_v50 = vsel %vm302_vm7, %v1242_v48, 0.0 }
0x1758   : > { %v1245_v51 = vadd.f32 %v1244_v50, %v1243_v49 }
0x175a   : > { %1246 = vadd.xlane.f32.xlu0 %v1245_v51 }
0x17e3   : > { %v1247_v52 = vpop.xlane.xlu0 %1246 }
0x17e4   : > { %v1248_v53 = vrot.slane %v1247_v52, 4 }
0x17e6   : > { %v1249_v1 = vadd.f32 %v1248_v53, %v1247_v52 }
0x17e8   : > { %v1250_v54 = vrot.slane %v1249_v1, 2 }
0x17ea   : > { %v1251_v55 = vadd.f32 %v1250_v54, %v1249_v1 }
0x17ec   : > { %v1252_v37 = vrot.slane %v1251_v55, 1 }
0x17ee   : > { %v1253_v56 = vadd.f32 %v1252_v37, %v1251_v55 }
0x17f0   : > { %1426 = vpush %v1253_v56 }
0x1821   : > { %s1427_s24 = spop %1426 }
0x1822   : > { %v1255_v57 = vstv %s1427_s24 }
0x1823   : > { %1256 = vst [vmem:[%s201_s4] sm:$0xff] %v1255_v57 }
0x1824 PF: > { %p15_p8 = scmp.ge.s32.totalorder %s1643_s14, 4   ;;  %s2287_s9 = smov %s1586_s10 }
0x1825   : > { %s2288_s10 = smov %s1590_s11  ;;  %s2289_s11 = smov %s1653_s17 }
0x1826   : > { %s2290_s12 = smov %s1643_s14  ;;  %17 = sbr.rel (!%p15_p8) target bundleno = 5 (0x5), region = 81 }
0x182b   :  { %1276 = vsyncpa [#allocation3], 1 }
0x182c   :  { %1278 = vsyncpa [#allocation3 + $0x1], 1 }
0x182d   :  { %1279 = vsyncpa [#allocation5], 1 }
0x182e   :  { %1281 = vsyncpa [#allocation5 + $0x1], 1 }

</bundles_post_ra>
